<compile_context>
chip_gen: v7x
topology: tpu7x:2x2x1
jax: 0.10.0
libtpu: 0.0.40
codegen_flags: <defaults>
</compile_context>

<pallas_src>
import numpy as np
import jax
import jax.numpy as jnp
from jax.experimental import pallas as pl
from jax.experimental.pallas import tpu as pltpu

PRE_DIM = 16   # pre_fc output width, fixed by the module definition
BCHUNK = 8     # one sublane group per batch chunk


def _make_kernel(n_layers, seq_len, bchunk, hidden_dim):
    H = hidden_dim
    T = seq_len
    Bc = bchunk

    def kernel(*refs):
        it = iter(refs)
        x_ref = next(it)       # (T, Bc, input_dim)   time-major, sublane-padded
        h0_ref = next(it)      # (n_layers, Bc, H)
        c0_ref = next(it)      # (n_layers, Bc, H)
        wpre_ref = next(it)    # (input_dim, PRE_DIM)
        bpre_ref = next(it)    # (1, PRE_DIM)
        layer_w = [(next(it), next(it), next(it)) for _ in range(n_layers)]
        wfc_ref = next(it)     # (H, output_dim)
        bfc_ref = next(it)     # (1, output_dim)
        y_ref = next(it)       # (Bc, output_dim)
        hout_ref = next(it)    # (n_layers, Bc, H)
        cout_ref = next(it)    # (n_layers, Bc, H)
        seq_scr = next(it)     # VMEM (T, Bc, H)   inter-layer sequence
        gates_scr = next(it)   # VMEM (T, Bc, 4H)  hoisted ih gates + bias

        in_dim = x_ref.shape[-1]

        # pre_fc + ReLU for all (t, b) rows in ONE MXU matmul.
        x_flat = x_ref[...].reshape(T * Bc, in_dim)
        layer_in = jnp.maximum(
            jnp.dot(x_flat, wpre_ref[...],
                    preferred_element_type=jnp.float32) + bpre_ref[...],
            0.0)                                            # (T*Bc, PRE_DIM)

        h = None
        for l in range(n_layers):
            wih_ref, whh_ref, b_ref = layer_w[l]
            whh = whh_ref[...]

            # Hoisted input-to-hidden contribution (+ fused bias) for ALL
            # timesteps of this layer in one batched matmul, materialized
            # into a (T, Bc, 4H) VMEM scratch (aligned per-step loads, flat
            # vreg pressure).
            gates_scr[...] = (
                jnp.dot(layer_in, wih_ref[...],
                        preferred_element_type=jnp.float32) + b_ref[...]
            ).reshape(T, Bc, 4 * H)

            h = h0_ref[l]                                   # (Bc, H)
            c = c0_ref[l]                                   # (Bc, H)
            is_last_layer = (l == n_layers - 1)

            # Serial recurrence: only the (Bc,H)@(H,4H) matmul + one sigmoid
            # + one tanh(c) per step.  (T is small & static -> keep the
            # unroll; switch to lax.fori_loop with pl.ds if T grows >~32.)
            for t in range(T):
                g = gates_scr[t] + jnp.dot(
                    h, whh, preferred_element_type=jnp.float32)   # (Bc, 4H)
                sg = jax.nn.sigmoid(g)        # single full-width EUP pass
                i_g = sg[:, 0 * H:1 * H]
                f_g = sg[:, 1 * H:2 * H]
                # g-gate columns were pre-scaled by 2 in the wrapper, so
                # tanh(z) = 2*sigmoid(2z) - 1  (VPU mul/sub, no extra EUP).
                g_g = 2.0 * sg[:, 2 * H:3 * H] - 1.0
                o_g = sg[:, 3 * H:4 * H]
                c = f_g * c + i_g * g_g
                h = o_g * jnp.tanh(c)
                if not is_last_layer:
                    seq_scr[t] = h

            hout_ref[l] = h
            cout_ref[l] = c
            if not is_last_layer:
                layer_in = seq_scr[...].reshape(T * Bc, H)

        # fc applied to out[:, -1, :]  (== last layer's final hidden state)
        y_ref[...] = (jnp.dot(h, wfc_ref[...],
                              preferred_element_type=jnp.float32)
                      + bfc_ref[...])

    return kernel


def lstm_predictor_forward(params, x, hidden):
    h0, c0 = hidden
    n_layers = len(params["lstm"])
    B, T, input_dim = x.shape
    H = params["lstm"][0]["whh_t"].shape[0]
    out_dim = params["fc_w_t"].shape[1]

    # Pad batch to a multiple of 8 (one sublane group) -> every per-step slab
    # inside the kernel is vreg-aligned.  Garbage rows are sliced off below.
    Bp = ((B + BCHUNK - 1) // BCHUNK) * BCHUNK
    pad = Bp - B

    # Time-major layout (T, Bp, input_dim): row block t is one aligned slab.
    x_tm = jnp.transpose(x, (1, 0, 2)).astype(jnp.float32)
    h0 = h0.astype(jnp.float32)
    c0 = c0.astype(jnp.float32)
    if pad:
        x_tm = jnp.pad(x_tm, ((0, 0), (0, pad), (0, 0)))
        h0 = jnp.pad(h0, ((0, 0), (0, pad), (0, 0)))
        c0 = jnp.pad(c0, ((0, 0), (0, pad), (0, 0)))

    # Pre-scale the g-gate (cell candidate) columns by 2 so the kernel uses
    # tanh(z) = 2*sigmoid(2z) - 1 with a single full-width sigmoid per step.
    g_scale = jnp.concatenate(
        [jnp.ones((1, 2 * H), jnp.float32),
         jnp.full((1, H), 2.0, jnp.float32),
         jnp.ones((1, H), jnp.float32)], axis=1)
    lstm_scaled = [{"wih_t": lp["wih_t"] * g_scale,
                    "whh_t": lp["whh_t"] * g_scale,
                    "b": lp["b"] * g_scale} for lp in params["lstm"]]

    inputs = [x_tm, h0, c0, params["pre_w_t"], params["pre_b"]]
    for lp in lstm_scaled:
        inputs += [lp["wih_t"], lp["whh_t"], lp["b"]]
    inputs += [params["fc_w_t"], params["fc_b"]]

    def rep(shape):
        # whole-array block, identical for every batch-chunk grid step
        return pl.BlockSpec(shape, lambda i: tuple(0 for _ in shape))

    in_specs = [
        pl.BlockSpec((T, BCHUNK, input_dim), lambda i: (0, i, 0)),   # x
        pl.BlockSpec((n_layers, BCHUNK, H), lambda i: (0, i, 0)),    # h0
        pl.BlockSpec((n_layers, BCHUNK, H), lambda i: (0, i, 0)),    # c0
        rep(params["pre_w_t"].shape),
        rep(params["pre_b"].shape),
    ]
    for lp in lstm_scaled:
        in_specs += [rep(lp["wih_t"].shape), rep(lp["whh_t"].shape),
                     rep(lp["b"].shape)]
    in_specs += [rep(params["fc_w_t"].shape), rep(params["fc_b"].shape)]

    out_specs = (
        pl.BlockSpec((BCHUNK, out_dim), lambda i: (i, 0)),
        pl.BlockSpec((n_layers, BCHUNK, H), lambda i: (0, i, 0)),
        pl.BlockSpec((n_layers, BCHUNK, H), lambda i: (0, i, 0)),
    )

    y, h_n, c_n = pl.pallas_call(
        _make_kernel(n_layers, T, BCHUNK, H),
        out_shape=(
            jax.ShapeDtypeStruct((Bp, out_dim), jnp.float32),
            jax.ShapeDtypeStruct((n_layers, Bp, H), jnp.float32),
            jax.ShapeDtypeStruct((n_layers, Bp, H), jnp.float32),
        ),
        grid=(Bp // BCHUNK,),           # independent batch chunks
        in_specs=in_specs,
        out_specs=out_specs,
        scratch_shapes=[pltpu.VMEM((T, BCHUNK, H), jnp.float32),
                        pltpu.VMEM((T, BCHUNK, 4 * H), jnp.float32)],
        compiler_params=pltpu.CompilerParams(
            dimension_semantics=("parallel",)),   # shards across TCs on v7x
    )(*inputs)

    return y[:B], (h_n[:, :B, :], c_n[:, :B, :])


def init_params(key, input_dim, hidden_dim, output_dim, n_layers):
    ks = iter(jax.random.split(key, 4 + 4 * n_layers))

    def u(k, shape, scale):
        return jax.random.uniform(k, shape, jnp.float32, -scale, scale)

    params = {
        "pre_w_t": u(next(ks), (input_dim, PRE_DIM), 1.0 / np.sqrt(input_dim)),
        "pre_b": u(next(ks), (1, PRE_DIM), 1.0 / np.sqrt(input_dim)),
        "fc_w_t": u(next(ks), (hidden_dim, output_dim), 1.0 / np.sqrt(hidden_dim)),
        "fc_b": u(next(ks), (1, output_dim), 1.0 / np.sqrt(hidden_dim)),
        "lstm": [],
    }
    s = 1.0 / np.sqrt(hidden_dim)
    for l in range(n_layers):
        in_size = PRE_DIM if l == 0 else hidden_dim
        wih_t = u(next(ks), (in_size, 4 * hidden_dim), s)
        whh_t = u(next(ks), (hidden_dim, 4 * hidden_dim), s)
        b_ih = u(next(ks), (1, 4 * hidden_dim), s)
        b_hh = u(next(ks), (1, 4 * hidden_dim), s)
        # PyTorch adds both biases; fuse them (mathematically identical).
        params["lstm"].append({"wih_t": wih_t, "whh_t": whh_t, "b": b_ih + b_hh})
    return params


def reference_forward(params, x, hidden):
    # Pure numpy (float64) reference for correctness checking.
    def sigmoid(z):
        return 1.0 / (1.0 + np.exp(-z))

    x = np.asarray(x, np.float64)
    h = np.asarray(hidden[0], np.float64).copy()
    c = np.asarray(hidden[1], np.float64).copy()
    wpre = np.asarray(params["pre_w_t"], np.float64)
    bpre = np.asarray(params["pre_b"], np.float64)
    B, T, _ = x.shape
    H = h.shape[-1]
    layer_in = np.maximum(x @ wpre + bpre[None], 0.0)  # (B, T, PRE_DIM)
    for l, lp in enumerate(params["lstm"]):
        wih = np.asarray(lp["wih_t"], np.float64)
        whh = np.asarray(lp["whh_t"], np.float64)
        b = np.asarray(lp["b"], np.float64)
        hl, cl = h[l].copy(), c[l].copy()
        outs = np.zeros((B, T, H))
        for t in range(T):
            gates = layer_in[:, t, :] @ wih + hl @ whh + b
            i_g = sigmoid(gates[:, 0 * H:1 * H])
            f_g = sigmoid(gates[:, 1 * H:2 * H])
            g_g = np.tanh(gates[:, 2 * H:3 * H])
            o_g = sigmoid(gates[:, 3 * H:4 * H])
            cl = f_g * cl + i_g * g_g
            hl = o_g * np.tanh(cl)
            outs[:, t, :] = hl
        layer_in = outs
        h[l] = hl
        c[l] = cl
    y = (layer_in[:, -1, :] @ np.asarray(params["fc_w_t"], np.float64)
         + np.asarray(params["fc_b"], np.float64))
    return y, (h, c)


if __name__ == "__main__":
    input_dim, hidden_dim, output_dim, n_layers = 4, 32, 2, 2
    batch, seq = 2, 8

    key = jax.random.PRNGKey(0)
    kp, kx = jax.random.split(key)
    params = init_params(kp, input_dim, hidden_dim, output_dim, n_layers)
    x = jax.random.normal(kx, (batch, seq, input_dim), jnp.float32)
    # init_hidden(batch_size) equivalent: zeros of (n_layers, B, H)
    hidden = (jnp.zeros((n_layers, batch, hidden_dim), jnp.float32),
              jnp.zeros((n_layers, batch, hidden_dim), jnp.float32))

    y, (h_n, c_n) = lstm_predictor_forward(params, x, hidden)
    jax.block_until_ready((y, h_n, c_n))

    y_ref, (h_ref, c_ref) = reference_forward(params, x, hidden)
    # f32 MXU accumulation end-to-end -> tight tolerances.
    np.testing.assert_allclose(np.asarray(y), y_ref, rtol=1e-3, atol=1e-4)
    np.testing.assert_allclose(np.asarray(h_n), h_ref, rtol=1e-3, atol=1e-4)
    np.testing.assert_allclose(np.asarray(c_n), c_ref, rtol=1e-3, atol=1e-4)

    print("KERNEL_OK")
</pallas_src>

<mosaic_0001>
module attributes {stable_mosaic.version = 11 : i64} {
  func.func @kernel(%arg0: i32, %arg1: memref<8x8x4xf32, #tpu.memory_space<vmem>>, %arg2: memref<2x8x32xf32, #tpu.memory_space<vmem>>, %arg3: memref<2x8x32xf32, #tpu.memory_space<vmem>>, %arg4: memref<4x16xf32, #tpu.memory_space<vmem>>, %arg5: memref<1x16xf32, #tpu.memory_space<vmem>>, %arg6: memref<16x128xf32, #tpu.memory_space<vmem>>, %arg7: memref<32x128xf32, #tpu.memory_space<vmem>>, %arg8: memref<1x128xf32, #tpu.memory_space<vmem>>, %arg9: memref<32x128xf32, #tpu.memory_space<vmem>>, %arg10: memref<32x128xf32, #tpu.memory_space<vmem>>, %arg11: memref<1x128xf32, #tpu.memory_space<vmem>>, %arg12: memref<32x2xf32, #tpu.memory_space<vmem>>, %arg13: memref<1x2xf32, #tpu.memory_space<vmem>>, %arg14: memref<8x2xf32, #tpu.memory_space<vmem>>, %arg15: memref<2x8x32xf32, #tpu.memory_space<vmem>>, %arg16: memref<2x8x32xf32, #tpu.memory_space<vmem>>, %arg17: memref<8x8x32xf32, #tpu.memory_space<vmem>>, %arg18: memref<8x8x128xf32, #tpu.memory_space<vmem>>) attributes {dimension_semantics = [#tpu.dimension_semantics<parallel>], iteration_bounds = array<i64: 1>, scalar_prefetch = 0 : i64, scratch_operands = 2 : i64, tpu.core_type = #tpu.core_type<tc>, window_params = [{transform_indices = @transform_0, window_bounds = array<i64: 8, 8, 4>}, {transform_indices = @transform_1, window_bounds = array<i64: 2, 8, 32>}, {transform_indices = @transform_2, window_bounds = array<i64: 2, 8, 32>}, {pipeline_mode = #tpu.pipeline_mode<synchronous>, transform_indices = @transform_3, window_bounds = array<i64: 4, 16>}, {pipeline_mode = #tpu.pipeline_mode<synchronous>, transform_indices = @transform_4, window_bounds = array<i64: 1, 16>}, {pipeline_mode = #tpu.pipeline_mode<synchronous>, transform_indices = @transform_5, window_bounds = array<i64: 16, 128>}, {pipeline_mode = #tpu.pipeline_mode<synchronous>, transform_indices = @transform_6, window_bounds = array<i64: 32, 128>}, {pipeline_mode = #tpu.pipeline_mode<synchronous>, transform_indices = @transform_7, window_bounds = array<i64: 1, 128>}, {pipeline_mode = #tpu.pipeline_mode<synchronous>, transform_indices = @transform_8, window_bounds = array<i64: 32, 128>}, {pipeline_mode = #tpu.pipeline_mode<synchronous>, transform_indices = @transform_9, window_bounds = array<i64: 32, 128>}, {pipeline_mode = #tpu.pipeline_mode<synchronous>, transform_indices = @transform_10, window_bounds = array<i64: 1, 128>}, {pipeline_mode = #tpu.pipeline_mode<synchronous>, transform_indices = @transform_11, window_bounds = array<i64: 32, 2>}, {pipeline_mode = #tpu.pipeline_mode<synchronous>, transform_indices = @transform_12, window_bounds = array<i64: 1, 2>}, {transform_indices = @transform_13, window_bounds = array<i64: 8, 2>}, {transform_indices = @transform_14, window_bounds = array<i64: 2, 8, 32>}, {transform_indices = @transform_15, window_bounds = array<i64: 2, 8, 32>}]} {
    %c0 = arith.constant 0 : index
    %c0_0 = arith.constant 0 : index
    %c0_1 = arith.constant 0 : index
    %0 = vector.load %arg1[%c0, %c0_0, %c0_1] : memref<8x8x4xf32, #tpu.memory_space<vmem>>, vector<8x8x4xf32>
    %1 = vector.shape_cast %0 : vector<8x8x4xf32> to vector<64x4xf32>
    %c0_2 = arith.constant 0 : index
    %c0_3 = arith.constant 0 : index
    %2 = vector.load %arg4[%c0_2, %c0_3] : memref<4x16xf32, #tpu.memory_space<vmem>>, vector<4x16xf32>
    %cst = arith.constant dense<0.000000e+00> : vector<64x16xf32>
    %3 = tpu.matmul %1, %2, %cst {dimension_numbers = #tpu.dot_dimension_numbers<[1], [0], [0], [1], [0, 0, 1, 1], [], []>} : vector<64x4xf32>, vector<4x16xf32>, vector<64x16xf32> -> vector<64x16xf32>
    %c0_4 = arith.constant 0 : index
    %c0_5 = arith.constant 0 : index
    %4 = vector.load %arg5[%c0_4, %c0_5] : memref<1x16xf32, #tpu.memory_space<vmem>>, vector<1x16xf32>
    %5 = vector.broadcast %4 : vector<1x16xf32> to vector<64x16xf32>
    %6 = arith.addf %3, %5 : vector<64x16xf32>
    %cst_6 = arith.constant 0.000000e+00 : f32
    %7 = vector.broadcast %cst_6 : f32 to vector<64x16xf32>
    %8 = arith.maximumf %6, %7 : vector<64x16xf32>
    %c0_7 = arith.constant 0 : index
    %c0_8 = arith.constant 0 : index
    %9 = vector.load %arg7[%c0_7, %c0_8] : memref<32x128xf32, #tpu.memory_space<vmem>>, vector<32x128xf32>
    %c0_9 = arith.constant 0 : index
    %c0_10 = arith.constant 0 : index
    %10 = vector.load %arg6[%c0_9, %c0_10] : memref<16x128xf32, #tpu.memory_space<vmem>>, vector<16x128xf32>
    %cst_11 = arith.constant dense<0.000000e+00> : vector<64x128xf32>
    %11 = tpu.matmul %8, %10, %cst_11 {dimension_numbers = #tpu.dot_dimension_numbers<[1], [0], [0], [1], [0, 0, 1, 1], [], []>} : vector<64x16xf32>, vector<16x128xf32>, vector<64x128xf32> -> vector<64x128xf32>
    %c0_12 = arith.constant 0 : index
    %c0_13 = arith.constant 0 : index
    %12 = vector.load %arg8[%c0_12, %c0_13] : memref<1x128xf32, #tpu.memory_space<vmem>>, vector<1x128xf32>
    %13 = vector.broadcast %12 : vector<1x128xf32> to vector<64x128xf32>
    %14 = arith.addf %11, %13 : vector<64x128xf32>
    %15 = vector.shape_cast %14 : vector<64x128xf32> to vector<8x8x128xf32>
    %c0_14 = arith.constant 0 : index
    %c0_15 = arith.constant 0 : index
    %c0_16 = arith.constant 0 : index
    %16 = vector.load %arg18[%c0_14, %c0_15, %c0_16] : memref<8x8x128xf32, #tpu.memory_space<vmem>>, vector<8x8x128xf32>
    tpu.vector_store %arg18[%c0_14, %c0_15, %c0_16], %15 {strides = array<i32>} : memref<8x8x128xf32, #tpu.memory_space<vmem>>, vector<8x8x128xf32>,
    %c0_17 = arith.constant 0 : index
    %c0_18 = arith.constant 0 : index
    %c0_19 = arith.constant 0 : index
    %17 = vector.load %arg2[%c0_17, %c0_18, %c0_19] : memref<2x8x32xf32, #tpu.memory_space<vmem>>, vector<1x8x32xf32>
    %18 = vector.shape_cast %17 : vector<1x8x32xf32> to vector<8x32xf32>
    %c0_20 = arith.constant 0 : index
    %c0_21 = arith.constant 0 : index
    %c0_22 = arith.constant 0 : index
    %19 = vector.load %arg3[%c0_20, %c0_21, %c0_22] : memref<2x8x32xf32, #tpu.memory_space<vmem>>, vector<1x8x32xf32>
    %20 = vector.shape_cast %19 : vector<1x8x32xf32> to vector<8x32xf32>
    %c0_23 = arith.constant 0 : index
    %c0_24 = arith.constant 0 : index
    %c0_25 = arith.constant 0 : index
    %21 = vector.load %arg18[%c0_23, %c0_24, %c0_25] : memref<8x8x128xf32, #tpu.memory_space<vmem>>, vector<1x8x128xf32>
    %22 = vector.shape_cast %21 : vector<1x8x128xf32> to vector<8x128xf32>
    %cst_26 = arith.constant dense<0.000000e+00> : vector<8x128xf32>
    %23 = tpu.matmul %18, %9, %cst_26 {dimension_numbers = #tpu.dot_dimension_numbers<[1], [0], [0], [1], [0, 0, 1, 1], [], []>} : vector<8x32xf32>, vector<32x128xf32>, vector<8x128xf32> -> vector<8x128xf32>
    %24 = arith.addf %22, %23 : vector<8x128xf32>
    %25 = arith.negf %24 : vector<8x128xf32>
    %26 = math.exp %25 : vector<8x128xf32>
    %cst_27 = arith.constant 1.000000e+00 : f32
    %27 = vector.broadcast %cst_27 : f32 to vector<8x128xf32>
    %28 = arith.addf %27, %26 : vector<8x128xf32>
    %29 = arith.divf %27, %28 : vector<8x128xf32>
    %30 = vector.extract_strided_slice %29 {offsets = [0, 0], sizes = [8, 32], strides = [1, 1]} : vector<8x128xf32> to vector<8x32xf32>
    %31 = vector.extract_strided_slice %29 {offsets = [0, 32], sizes = [8, 32], strides = [1, 1]} : vector<8x128xf32> to vector<8x32xf32>
    %32 = vector.extract_strided_slice %29 {offsets = [0, 64], sizes = [8, 32], strides = [1, 1]} : vector<8x128xf32> to vector<8x32xf32>
    %cst_28 = arith.constant 2.000000e+00 : f32
    %33 = vector.broadcast %cst_28 : f32 to vector<8x32xf32>
    %34 = arith.mulf %33, %32 : vector<8x32xf32>
    %cst_29 = arith.constant 1.000000e+00 : f32
    %35 = vector.broadcast %cst_29 : f32 to vector<8x32xf32>
    %36 = arith.subf %34, %35 : vector<8x32xf32>
    %37 = vector.extract_strided_slice %29 {offsets = [0, 96], sizes = [8, 32], strides = [1, 1]} : vector<8x128xf32> to vector<8x32xf32>
    %38 = arith.mulf %31, %20 : vector<8x32xf32>
    %39 = arith.mulf %30, %36 : vector<8x32xf32>
    %40 = arith.addf %38, %39 : vector<8x32xf32>
    %41 = math.tanh %40 : vector<8x32xf32>
    %42 = arith.mulf %37, %41 : vector<8x32xf32>
    %c0_30 = arith.constant 0 : index
    %c0_31 = arith.constant 0 : index
    %c0_32 = arith.constant 0 : index
    %43 = vector.load %arg17[%c0_30, %c0_31, %c0_32] : memref<8x8x32xf32, #tpu.memory_space<vmem>>, vector<1x8x32xf32>
    %44 = vector.shape_cast %43 : vector<1x8x32xf32> to vector<8x32xf32>
    %45 = vector.shape_cast %42 : vector<8x32xf32> to vector<1x8x32xf32>
    tpu.vector_store %arg17[%c0_30, %c0_31, %c0_32], %45 {strides = array<i32>} : memref<8x8x32xf32, #tpu.memory_space<vmem>>, vector<1x8x32xf32>,
    %c1 = arith.constant 1 : index
    %c0_33 = arith.constant 0 : index
    %c0_34 = arith.constant 0 : index
    %46 = vector.load %arg18[%c1, %c0_33, %c0_34] : memref<8x8x128xf32, #tpu.memory_space<vmem>>, vector<1x8x128xf32>
    %47 = vector.shape_cast %46 : vector<1x8x128xf32> to vector<8x128xf32>
    %cst_35 = arith.constant dense<0.000000e+00> : vector<8x128xf32>
    %48 = tpu.matmul %42, %9, %cst_35 {dimension_numbers = #tpu.dot_dimension_numbers<[1], [0], [0], [1], [0, 0, 1, 1], [], []>} : vector<8x32xf32>, vector<32x128xf32>, vector<8x128xf32> -> vector<8x128xf32>
    %49 = arith.addf %47, %48 : vector<8x128xf32>
    %50 = arith.negf %49 : vector<8x128xf32>
    %51 = math.exp %50 : vector<8x128xf32>
    %cst_36 = arith.constant 1.000000e+00 : f32
    %52 = vector.broadcast %cst_36 : f32 to vector<8x128xf32>
    %53 = arith.addf %52, %51 : vector<8x128xf32>
    %54 = arith.divf %52, %53 : vector<8x128xf32>
    %55 = vector.extract_strided_slice %54 {offsets = [0, 0], sizes = [8, 32], strides = [1, 1]} : vector<8x128xf32> to vector<8x32xf32>
    %56 = vector.extract_strided_slice %54 {offsets = [0, 32], sizes = [8, 32], strides = [1, 1]} : vector<8x128xf32> to vector<8x32xf32>
    %57 = vector.extract_strided_slice %54 {offsets = [0, 64], sizes = [8, 32], strides = [1, 1]} : vector<8x128xf32> to vector<8x32xf32>
    %cst_37 = arith.constant 2.000000e+00 : f32
    %58 = vector.broadcast %cst_37 : f32 to vector<8x32xf32>
    %59 = arith.mulf %58, %57 : vector<8x32xf32>
    %cst_38 = arith.constant 1.000000e+00 : f32
    %60 = vector.broadcast %cst_38 : f32 to vector<8x32xf32>
    %61 = arith.subf %59, %60 : vector<8x32xf32>
    %62 = vector.extract_strided_slice %54 {offsets = [0, 96], sizes = [8, 32], strides = [1, 1]} : vector<8x128xf32> to vector<8x32xf32>
    %63 = arith.mulf %56, %40 : vector<8x32xf32>
    %64 = arith.mulf %55, %61 : vector<8x32xf32>
    %65 = arith.addf %63, %64 : vector<8x32xf32>
    %66 = math.tanh %65 : vector<8x32xf32>
    %67 = arith.mulf %62, %66 : vector<8x32xf32>
    %c1_39 = arith.constant 1 : index
    %c0_40 = arith.constant 0 : index
    %c0_41 = arith.constant 0 : index
    %68 = vector.load %arg17[%c1_39, %c0_40, %c0_41] : memref<8x8x32xf32, #tpu.memory_space<vmem>>, vector<1x8x32xf32>
    %69 = vector.shape_cast %68 : vector<1x8x32xf32> to vector<8x32xf32>
    %70 = vector.shape_cast %67 : vector<8x32xf32> to vector<1x8x32xf32>
    tpu.vector_store %arg17[%c1_39, %c0_40, %c0_41], %70 {strides = array<i32>} : memref<8x8x32xf32, #tpu.memory_space<vmem>>, vector<1x8x32xf32>,
    %c2 = arith.constant 2 : index
    %c0_42 = arith.constant 0 : index
    %c0_43 = arith.constant 0 : index
    %71 = vector.load %arg18[%c2, %c0_42, %c0_43] : memref<8x8x128xf32, #tpu.memory_space<vmem>>, vector<1x8x128xf32>
    %72 = vector.shape_cast %71 : vector<1x8x128xf32> to vector<8x128xf32>
    %cst_44 = arith.constant dense<0.000000e+00> : vector<8x128xf32>
    %73 = tpu.matmul %67, %9, %cst_44 {dimension_numbers = #tpu.dot_dimension_numbers<[1], [0], [0], [1], [0, 0, 1, 1], [], []>} : vector<8x32xf32>, vector<32x128xf32>, vector<8x128xf32> -> vector<8x128xf32>
    %74 = arith.addf %72, %73 : vector<8x128xf32>
    %75 = arith.negf %74 : vector<8x128xf32>
    %76 = math.exp %75 : vector<8x128xf32>
    %cst_45 = arith.constant 1.000000e+00 : f32
    %77 = vector.broadcast %cst_45 : f32 to vector<8x128xf32>
    %78 = arith.addf %77, %76 : vector<8x128xf32>
    %79 = arith.divf %77, %78 : vector<8x128xf32>
    %80 = vector.extract_strided_slice %79 {offsets = [0, 0], sizes = [8, 32], strides = [1, 1]} : vector<8x128xf32> to vector<8x32xf32>
    %81 = vector.extract_strided_slice %79 {offsets = [0, 32], sizes = [8, 32], strides = [1, 1]} : vector<8x128xf32> to vector<8x32xf32>
    %82 = vector.extract_strided_slice %79 {offsets = [0, 64], sizes = [8, 32], strides = [1, 1]} : vector<8x128xf32> to vector<8x32xf32>
    %cst_46 = arith.constant 2.000000e+00 : f32
    %83 = vector.broadcast %cst_46 : f32 to vector<8x32xf32>
    %84 = arith.mulf %83, %82 : vector<8x32xf32>
    %cst_47 = arith.constant 1.000000e+00 : f32
    %85 = vector.broadcast %cst_47 : f32 to vector<8x32xf32>
    %86 = arith.subf %84, %85 : vector<8x32xf32>
    %87 = vector.extract_strided_slice %79 {offsets = [0, 96], sizes = [8, 32], strides = [1, 1]} : vector<8x128xf32> to vector<8x32xf32>
    %88 = arith.mulf %81, %65 : vector<8x32xf32>
    %89 = arith.mulf %80, %86 : vector<8x32xf32>
    %90 = arith.addf %88, %89 : vector<8x32xf32>
    %91 = math.tanh %90 : vector<8x32xf32>
    %92 = arith.mulf %87, %91 : vector<8x32xf32>
    %c2_48 = arith.constant 2 : index
    %c0_49 = arith.constant 0 : index
    %c0_50 = arith.constant 0 : index
    %93 = vector.load %arg17[%c2_48, %c0_49, %c0_50] : memref<8x8x32xf32, #tpu.memory_space<vmem>>, vector<1x8x32xf32>
    %94 = vector.shape_cast %93 : vector<1x8x32xf32> to vector<8x32xf32>
    %95 = vector.shape_cast %92 : vector<8x32xf32> to vector<1x8x32xf32>
    tpu.vector_store %arg17[%c2_48, %c0_49, %c0_50], %95 {strides = array<i32>} : memref<8x8x32xf32, #tpu.memory_space<vmem>>, vector<1x8x32xf32>,
    %c3 = arith.constant 3 : index
    %c0_51 = arith.constant 0 : index
    %c0_52 = arith.constant 0 : index
    %96 = vector.load %arg18[%c3, %c0_51, %c0_52] : memref<8x8x128xf32, #tpu.memory_space<vmem>>, vector<1x8x128xf32>
    %97 = vector.shape_cast %96 : vector<1x8x128xf32> to vector<8x128xf32>
    %cst_53 = arith.constant dense<0.000000e+00> : vector<8x128xf32>
    %98 = tpu.matmul %92, %9, %cst_53 {dimension_numbers = #tpu.dot_dimension_numbers<[1], [0], [0], [1], [0, 0, 1, 1], [], []>} : vector<8x32xf32>, vector<32x128xf32>, vector<8x128xf32> -> vector<8x128xf32>
    %99 = arith.addf %97, %98 : vector<8x128xf32>
    %100 = arith.negf %99 : vector<8x128xf32>
    %101 = math.exp %100 : vector<8x128xf32>
    %cst_54 = arith.constant 1.000000e+00 : f32
    %102 = vector.broadcast %cst_54 : f32 to vector<8x128xf32>
    %103 = arith.addf %102, %101 : vector<8x128xf32>
    %104 = arith.divf %102, %103 : vector<8x128xf32>
    %105 = vector.extract_strided_slice %104 {offsets = [0, 0], sizes = [8, 32], strides = [1, 1]} : vector<8x128xf32> to vector<8x32xf32>
    %106 = vector.extract_strided_slice %104 {offsets = [0, 32], sizes = [8, 32], strides = [1, 1]} : vector<8x128xf32> to vector<8x32xf32>
    %107 = vector.extract_strided_slice %104 {offsets = [0, 64], sizes = [8, 32], strides = [1, 1]} : vector<8x128xf32> to vector<8x32xf32>
    %cst_55 = arith.constant 2.000000e+00 : f32
    %108 = vector.broadcast %cst_55 : f32 to vector<8x32xf32>
    %109 = arith.mulf %108, %107 : vector<8x32xf32>
    %cst_56 = arith.constant 1.000000e+00 : f32
    %110 = vector.broadcast %cst_56 : f32 to vector<8x32xf32>
    %111 = arith.subf %109, %110 : vector<8x32xf32>
    %112 = vector.extract_strided_slice %104 {offsets = [0, 96], sizes = [8, 32], strides = [1, 1]} : vector<8x128xf32> to vector<8x32xf32>
    %113 = arith.mulf %106, %90 : vector<8x32xf32>
    %114 = arith.mulf %105, %111 : vector<8x32xf32>
    %115 = arith.addf %113, %114 : vector<8x32xf32>
    %116 = math.tanh %115 : vector<8x32xf32>
    %117 = arith.mulf %112, %116 : vector<8x32xf32>
    %c3_57 = arith.constant 3 : index
    %c0_58 = arith.constant 0 : index
    %c0_59 = arith.constant 0 : index
    %118 = vector.load %arg17[%c3_57, %c0_58, %c0_59] : memref<8x8x32xf32, #tpu.memory_space<vmem>>, vector<1x8x32xf32>
    %119 = vector.shape_cast %118 : vector<1x8x32xf32> to vector<8x32xf32>
    %120 = vector.shape_cast %117 : vector<8x32xf32> to vector<1x8x32xf32>
    tpu.vector_store %arg17[%c3_57, %c0_58, %c0_59], %120 {strides = array<i32>} : memref<8x8x32xf32, #tpu.memory_space<vmem>>, vector<1x8x32xf32>,
    %c4 = arith.constant 4 : index
    %c0_60 = arith.constant 0 : index
    %c0_61 = arith.constant 0 : index
    %121 = vector.load %arg18[%c4, %c0_60, %c0_61] : memref<8x8x128xf32, #tpu.memory_space<vmem>>, vector<1x8x128xf32>
    %122 = vector.shape_cast %121 : vector<1x8x128xf32> to vector<8x128xf32>
    %cst_62 = arith.constant dense<0.000000e+00> : vector<8x128xf32>
    %123 = tpu.matmul %117, %9, %cst_62 {dimension_numbers = #tpu.dot_dimension_numbers<[1], [0], [0], [1], [0, 0, 1, 1], [], []>} : vector<8x32xf32>, vector<32x128xf32>, vector<8x128xf32> -> vector<8x128xf32>
    %124 = arith.addf %122, %123 : vector<8x128xf32>
    %125 = arith.negf %124 : vector<8x128xf32>
    %126 = math.exp %125 : vector<8x128xf32>
    %cst_63 = arith.constant 1.000000e+00 : f32
    %127 = vector.broadcast %cst_63 : f32 to vector<8x128xf32>
    %128 = arith.addf %127, %126 : vector<8x128xf32>
    %129 = arith.divf %127, %128 : vector<8x128xf32>
    %130 = vector.extract_strided_slice %129 {offsets = [0, 0], sizes = [8, 32], strides = [1, 1]} : vector<8x128xf32> to vector<8x32xf32>
    %131 = vector.extract_strided_slice %129 {offsets = [0, 32], sizes = [8, 32], strides = [1, 1]} : vector<8x128xf32> to vector<8x32xf32>
    %132 = vector.extract_strided_slice %129 {offsets = [0, 64], sizes = [8, 32], strides = [1, 1]} : vector<8x128xf32> to vector<8x32xf32>
    %cst_64 = arith.constant 2.000000e+00 : f32
    %133 = vector.broadcast %cst_64 : f32 to vector<8x32xf32>
    %134 = arith.mulf %133, %132 : vector<8x32xf32>
    %cst_65 = arith.constant 1.000000e+00 : f32
    %135 = vector.broadcast %cst_65 : f32 to vector<8x32xf32>
    %136 = arith.subf %134, %135 : vector<8x32xf32>
    %137 = vector.extract_strided_slice %129 {offsets = [0, 96], sizes = [8, 32], strides = [1, 1]} : vector<8x128xf32> to vector<8x32xf32>
    %138 = arith.mulf %131, %115 : vector<8x32xf32>
    %139 = arith.mulf %130, %136 : vector<8x32xf32>
    %140 = arith.addf %138, %139 : vector<8x32xf32>
    %141 = math.tanh %140 : vector<8x32xf32>
    %142 = arith.mulf %137, %141 : vector<8x32xf32>
    %c4_66 = arith.constant 4 : index
    %c0_67 = arith.constant 0 : index
    %c0_68 = arith.constant 0 : index
    %143 = vector.load %arg17[%c4_66, %c0_67, %c0_68] : memref<8x8x32xf32, #tpu.memory_space<vmem>>, vector<1x8x32xf32>
    %144 = vector.shape_cast %143 : vector<1x8x32xf32> to vector<8x32xf32>
    %145 = vector.shape_cast %142 : vector<8x32xf32> to vector<1x8x32xf32>
    tpu.vector_store %arg17[%c4_66, %c0_67, %c0_68], %145 {strides = array<i32>} : memref<8x8x32xf32, #tpu.memory_space<vmem>>, vector<1x8x32xf32>,
    %c5 = arith.constant 5 : index
    %c0_69 = arith.constant 0 : index
    %c0_70 = arith.constant 0 : index
    %146 = vector.load %arg18[%c5, %c0_69, %c0_70] : memref<8x8x128xf32, #tpu.memory_space<vmem>>, vector<1x8x128xf32>
    %147 = vector.shape_cast %146 : vector<1x8x128xf32> to vector<8x128xf32>
    %cst_71 = arith.constant dense<0.000000e+00> : vector<8x128xf32>
    %148 = tpu.matmul %142, %9, %cst_71 {dimension_numbers = #tpu.dot_dimension_numbers<[1], [0], [0], [1], [0, 0, 1, 1], [], []>} : vector<8x32xf32>, vector<32x128xf32>, vector<8x128xf32> -> vector<8x128xf32>
    %149 = arith.addf %147, %148 : vector<8x128xf32>
    %150 = arith.negf %149 : vector<8x128xf32>
    %151 = math.exp %150 : vector<8x128xf32>
    %cst_72 = arith.constant 1.000000e+00 : f32
    %152 = vector.broadcast %cst_72 : f32 to vector<8x128xf32>
    %153 = arith.addf %152, %151 : vector<8x128xf32>
    %154 = arith.divf %152, %153 : vector<8x128xf32>
    %155 = vector.extract_strided_slice %154 {offsets = [0, 0], sizes = [8, 32], strides = [1, 1]} : vector<8x128xf32> to vector<8x32xf32>
    %156 = vector.extract_strided_slice %154 {offsets = [0, 32], sizes = [8, 32], strides = [1, 1]} : vector<8x128xf32> to vector<8x32xf32>
    %157 = vector.extract_strided_slice %154 {offsets = [0, 64], sizes = [8, 32], strides = [1, 1]} : vector<8x128xf32> to vector<8x32xf32>
    %cst_73 = arith.constant 2.000000e+00 : f32
    %158 = vector.broadcast %cst_73 : f32 to vector<8x32xf32>
    %159 = arith.mulf %158, %157 : vector<8x32xf32>
    %cst_74 = arith.constant 1.000000e+00 : f32
    %160 = vector.broadcast %cst_74 : f32 to vector<8x32xf32>
    %161 = arith.subf %159, %160 : vector<8x32xf32>
    %162 = vector.extract_strided_slice %154 {offsets = [0, 96], sizes = [8, 32], strides = [1, 1]} : vector<8x128xf32> to vector<8x32xf32>
    %163 = arith.mulf %156, %140 : vector<8x32xf32>
    %164 = arith.mulf %155, %161 : vector<8x32xf32>
    %165 = arith.addf %163, %164 : vector<8x32xf32>
    %166 = math.tanh %165 : vector<8x32xf32>
    %167 = arith.mulf %162, %166 : vector<8x32xf32>
    %c5_75 = arith.constant 5 : index
    %c0_76 = arith.constant 0 : index
    %c0_77 = arith.constant 0 : index
    %168 = vector.load %arg17[%c5_75, %c0_76, %c0_77] : memref<8x8x32xf32, #tpu.memory_space<vmem>>, vector<1x8x32xf32>
    %169 = vector.shape_cast %168 : vector<1x8x32xf32> to vector<8x32xf32>
    %170 = vector.shape_cast %167 : vector<8x32xf32> to vector<1x8x32xf32>
    tpu.vector_store %arg17[%c5_75, %c0_76, %c0_77], %170 {strides = array<i32>} : memref<8x8x32xf32, #tpu.memory_space<vmem>>, vector<1x8x32xf32>,
    %c6 = arith.constant 6 : index
    %c0_78 = arith.constant 0 : index
    %c0_79 = arith.constant 0 : index
    %171 = vector.load %arg18[%c6, %c0_78, %c0_79] : memref<8x8x128xf32, #tpu.memory_space<vmem>>, vector<1x8x128xf32>
    %172 = vector.shape_cast %171 : vector<1x8x128xf32> to vector<8x128xf32>
    %cst_80 = arith.constant dense<0.000000e+00> : vector<8x128xf32>
    %173 = tpu.matmul %167, %9, %cst_80 {dimension_numbers = #tpu.dot_dimension_numbers<[1], [0], [0], [1], [0, 0, 1, 1], [], []>} : vector<8x32xf32>, vector<32x128xf32>, vector<8x128xf32> -> vector<8x128xf32>
    %174 = arith.addf %172, %173 : vector<8x128xf32>
    %175 = arith.negf %174 : vector<8x128xf32>
    %176 = math.exp %175 : vector<8x128xf32>
    %cst_81 = arith.constant 1.000000e+00 : f32
    %177 = vector.broadcast %cst_81 : f32 to vector<8x128xf32>
    %178 = arith.addf %177, %176 : vector<8x128xf32>
    %179 = arith.divf %177, %178 : vector<8x128xf32>
    %180 = vector.extract_strided_slice %179 {offsets = [0, 0], sizes = [8, 32], strides = [1, 1]} : vector<8x128xf32> to vector<8x32xf32>
    %181 = vector.extract_strided_slice %179 {offsets = [0, 32], sizes = [8, 32], strides = [1, 1]} : vector<8x128xf32> to vector<8x32xf32>
    %182 = vector.extract_strided_slice %179 {offsets = [0, 64], sizes = [8, 32], strides = [1, 1]} : vector<8x128xf32> to vector<8x32xf32>
    %cst_82 = arith.constant 2.000000e+00 : f32
    %183 = vector.broadcast %cst_82 : f32 to vector<8x32xf32>
    %184 = arith.mulf %183, %182 : vector<8x32xf32>
    %cst_83 = arith.constant 1.000000e+00 : f32
    %185 = vector.broadcast %cst_83 : f32 to vector<8x32xf32>
    %186 = arith.subf %184, %185 : vector<8x32xf32>
    %187 = vector.extract_strided_slice %179 {offsets = [0, 96], sizes = [8, 32], strides = [1, 1]} : vector<8x128xf32> to vector<8x32xf32>
    %188 = arith.mulf %181, %165 : vector<8x32xf32>
    %189 = arith.mulf %180, %186 : vector<8x32xf32>
    %190 = arith.addf %188, %189 : vector<8x32xf32>
    %191 = math.tanh %190 : vector<8x32xf32>
    %192 = arith.mulf %187, %191 : vector<8x32xf32>
    %c6_84 = arith.constant 6 : index
    %c0_85 = arith.constant 0 : index
    %c0_86 = arith.constant 0 : index
    %193 = vector.load %arg17[%c6_84, %c0_85, %c0_86] : memref<8x8x32xf32, #tpu.memory_space<vmem>>, vector<1x8x32xf32>
    %194 = vector.shape_cast %193 : vector<1x8x32xf32> to vector<8x32xf32>
    %195 = vector.shape_cast %192 : vector<8x32xf32> to vector<1x8x32xf32>
    tpu.vector_store %arg17[%c6_84, %c0_85, %c0_86], %195 {strides = array<i32>} : memref<8x8x32xf32, #tpu.memory_space<vmem>>, vector<1x8x32xf32>,
    %c7 = arith.constant 7 : index
    %c0_87 = arith.constant 0 : index
    %c0_88 = arith.constant 0 : index
    %196 = vector.load %arg18[%c7, %c0_87, %c0_88] : memref<8x8x128xf32, #tpu.memory_space<vmem>>, vector<1x8x128xf32>
    %197 = vector.shape_cast %196 : vector<1x8x128xf32> to vector<8x128xf32>
    %cst_89 = arith.constant dense<0.000000e+00> : vector<8x128xf32>
    %198 = tpu.matmul %192, %9, %cst_89 {dimension_numbers = #tpu.dot_dimension_numbers<[1], [0], [0], [1], [0, 0, 1, 1], [], []>} : vector<8x32xf32>, vector<32x128xf32>, vector<8x128xf32> -> vector<8x128xf32>
    %199 = arith.addf %197, %198 : vector<8x128xf32>
    %200 = arith.negf %199 : vector<8x128xf32>
    %201 = math.exp %200 : vector<8x128xf32>
    %cst_90 = arith.constant 1.000000e+00 : f32
    %202 = vector.broadcast %cst_90 : f32 to vector<8x128xf32>
    %203 = arith.addf %202, %201 : vector<8x128xf32>
    %204 = arith.divf %202, %203 : vector<8x128xf32>
    %205 = vector.extract_strided_slice %204 {offsets = [0, 0], sizes = [8, 32], strides = [1, 1]} : vector<8x128xf32> to vector<8x32xf32>
    %206 = vector.extract_strided_slice %204 {offsets = [0, 32], sizes = [8, 32], strides = [1, 1]} : vector<8x128xf32> to vector<8x32xf32>
    %207 = vector.extract_strided_slice %204 {offsets = [0, 64], sizes = [8, 32], strides = [1, 1]} : vector<8x128xf32> to vector<8x32xf32>
    %cst_91 = arith.constant 2.000000e+00 : f32
    %208 = vector.broadcast %cst_91 : f32 to vector<8x32xf32>
    %209 = arith.mulf %208, %207 : vector<8x32xf32>
    %cst_92 = arith.constant 1.000000e+00 : f32
    %210 = vector.broadcast %cst_92 : f32 to vector<8x32xf32>
    %211 = arith.subf %209, %210 : vector<8x32xf32>
    %212 = vector.extract_strided_slice %204 {offsets = [0, 96], sizes = [8, 32], strides = [1, 1]} : vector<8x128xf32> to vector<8x32xf32>
    %213 = arith.mulf %206, %190 : vector<8x32xf32>
    %214 = arith.mulf %205, %211 : vector<8x32xf32>
    %215 = arith.addf %213, %214 : vector<8x32xf32>
    %216 = math.tanh %215 : vector<8x32xf32>
    %217 = arith.mulf %212, %216 : vector<8x32xf32>
    %c7_93 = arith.constant 7 : index
    %c0_94 = arith.constant 0 : index
    %c0_95 = arith.constant 0 : index
    %218 = vector.load %arg17[%c7_93, %c0_94, %c0_95] : memref<8x8x32xf32, #tpu.memory_space<vmem>>, vector<1x8x32xf32>
    %219 = vector.shape_cast %218 : vector<1x8x32xf32> to vector<8x32xf32>
    %220 = vector.shape_cast %217 : vector<8x32xf32> to vector<1x8x32xf32>
    tpu.vector_store %arg17[%c7_93, %c0_94, %c0_95], %220 {strides = array<i32>} : memref<8x8x32xf32, #tpu.memory_space<vmem>>, vector<1x8x32xf32>,
    %c0_96 = arith.constant 0 : index
    %c0_97 = arith.constant 0 : index
    %c0_98 = arith.constant 0 : index
    %221 = vector.load %arg15[%c0_96, %c0_97, %c0_98] : memref<2x8x32xf32, #tpu.memory_space<vmem>>, vector<1x8x32xf32>
    %222 = vector.shape_cast %221 : vector<1x8x32xf32> to vector<8x32xf32>
    %223 = vector.shape_cast %217 : vector<8x32xf32> to vector<1x8x32xf32>
    tpu.vector_store %arg15[%c0_96, %c0_97, %c0_98], %223 {strides = array<i32>} : memref<2x8x32xf32, #tpu.memory_space<vmem>>, vector<1x8x32xf32>,
    %c0_99 = arith.constant 0 : index
    %c0_100 = arith.constant 0 : index
    %c0_101 = arith.constant 0 : index
    %224 = vector.load %arg16[%c0_99, %c0_100, %c0_101] : memref<2x8x32xf32, #tpu.memory_space<vmem>>, vector<1x8x32xf32>
    %225 = vector.shape_cast %224 : vector<1x8x32xf32> to vector<8x32xf32>
    %226 = vector.shape_cast %215 : vector<8x32xf32> to vector<1x8x32xf32>
    tpu.vector_store %arg16[%c0_99, %c0_100, %c0_101], %226 {strides = array<i32>} : memref<2x8x32xf32, #tpu.memory_space<vmem>>, vector<1x8x32xf32>,
    %c0_102 = arith.constant 0 : index
    %c0_103 = arith.constant 0 : index
    %c0_104 = arith.constant 0 : index
    %227 = vector.load %arg17[%c0_102, %c0_103, %c0_104] : memref<8x8x32xf32, #tpu.memory_space<vmem>>, vector<8x8x32xf32>
    %228 = vector.shape_cast %227 : vector<8x8x32xf32> to vector<64x32xf32>
    %c0_105 = arith.constant 0 : index
    %c0_106 = arith.constant 0 : index
    %229 = vector.load %arg10[%c0_105, %c0_106] : memref<32x128xf32, #tpu.memory_space<vmem>>, vector<32x128xf32>
    %c0_107 = arith.constant 0 : index
    %c0_108 = arith.constant 0 : index
    %230 = vector.load %arg9[%c0_107, %c0_108] : memref<32x128xf32, #tpu.memory_space<vmem>>, vector<32x128xf32>
    %cst_109 = arith.constant dense<0.000000e+00> : vector<64x128xf32>
    %231 = tpu.matmul %228, %230, %cst_109 {dimension_numbers = #tpu.dot_dimension_numbers<[1], [0], [0], [1], [0, 0, 1, 1], [], []>} : vector<64x32xf32>, vector<32x128xf32>, vector<64x128xf32> -> vector<64x128xf32>
    %c0_110 = arith.constant 0 : index
    %c0_111 = arith.constant 0 : index
    %232 = vector.load %arg11[%c0_110, %c0_111] : memref<1x128xf32, #tpu.memory_space<vmem>>, vector<1x128xf32>
    %233 = vector.broadcast %232 : vector<1x128xf32> to vector<64x128xf32>
    %234 = arith.addf %231, %233 : vector<64x128xf32>
    %235 = vector.shape_cast %234 : vector<64x128xf32> to vector<8x8x128xf32>
    %c0_112 = arith.constant 0 : index
    %c0_113 = arith.constant 0 : index
    %c0_114 = arith.constant 0 : index
    %236 = vector.load %arg18[%c0_112, %c0_113, %c0_114] : memref<8x8x128xf32, #tpu.memory_space<vmem>>, vector<8x8x128xf32>
    tpu.vector_store %arg18[%c0_112, %c0_113, %c0_114], %235 {strides = array<i32>} : memref<8x8x128xf32, #tpu.memory_space<vmem>>, vector<8x8x128xf32>,
    %c1_115 = arith.constant 1 : index
    %c0_116 = arith.constant 0 : index
    %c0_117 = arith.constant 0 : index
    %237 = vector.load %arg2[%c1_115, %c0_116, %c0_117] : memref<2x8x32xf32, #tpu.memory_space<vmem>>, vector<1x8x32xf32>
    %238 = vector.shape_cast %237 : vector<1x8x32xf32> to vector<8x32xf32>
    %c1_118 = arith.constant 1 : index
    %c0_119 = arith.constant 0 : index
    %c0_120 = arith.constant 0 : index
    %239 = vector.load %arg3[%c1_118, %c0_119, %c0_120] : memref<2x8x32xf32, #tpu.memory_space<vmem>>, vector<1x8x32xf32>
    %240 = vector.shape_cast %239 : vector<1x8x32xf32> to vector<8x32xf32>
    %c0_121 = arith.constant 0 : index
    %c0_122 = arith.constant 0 : index
    %c0_123 = arith.constant 0 : index
    %241 = vector.load %arg18[%c0_121, %c0_122, %c0_123] : memref<8x8x128xf32, #tpu.memory_space<vmem>>, vector<1x8x128xf32>
    %242 = vector.shape_cast %241 : vector<1x8x128xf32> to vector<8x128xf32>
    %cst_124 = arith.constant dense<0.000000e+00> : vector<8x128xf32>
    %243 = tpu.matmul %238, %229, %cst_124 {dimension_numbers = #tpu.dot_dimension_numbers<[1], [0], [0], [1], [0, 0, 1, 1], [], []>} : vector<8x32xf32>, vector<32x128xf32>, vector<8x128xf32> -> vector<8x128xf32>
    %244 = arith.addf %242, %243 : vector<8x128xf32>
    %245 = arith.negf %244 : vector<8x128xf32>
    %246 = math.exp %245 : vector<8x128xf32>
    %cst_125 = arith.constant 1.000000e+00 : f32
    %247 = vector.broadcast %cst_125 : f32 to vector<8x128xf32>
    %248 = arith.addf %247, %246 : vector<8x128xf32>
    %249 = arith.divf %247, %248 : vector<8x128xf32>
    %250 = vector.extract_strided_slice %249 {offsets = [0, 0], sizes = [8, 32], strides = [1, 1]} : vector<8x128xf32> to vector<8x32xf32>
    %251 = vector.extract_strided_slice %249 {offsets = [0, 32], sizes = [8, 32], strides = [1, 1]} : vector<8x128xf32> to vector<8x32xf32>
    %252 = vector.extract_strided_slice %249 {offsets = [0, 64], sizes = [8, 32], strides = [1, 1]} : vector<8x128xf32> to vector<8x32xf32>
    %cst_126 = arith.constant 2.000000e+00 : f32
    %253 = vector.broadcast %cst_126 : f32 to vector<8x32xf32>
    %254 = arith.mulf %253, %252 : vector<8x32xf32>
    %cst_127 = arith.constant 1.000000e+00 : f32
    %255 = vector.broadcast %cst_127 : f32 to vector<8x32xf32>
    %256 = arith.subf %254, %255 : vector<8x32xf32>
    %257 = vector.extract_strided_slice %249 {offsets = [0, 96], sizes = [8, 32], strides = [1, 1]} : vector<8x128xf32> to vector<8x32xf32>
    %258 = arith.mulf %251, %240 : vector<8x32xf32>
    %259 = arith.mulf %250, %256 : vector<8x32xf32>
    %260 = arith.addf %258, %259 : vector<8x32xf32>
    %261 = math.tanh %260 : vector<8x32xf32>
    %262 = arith.mulf %257, %261 : vector<8x32xf32>
    %c1_128 = arith.constant 1 : index
    %c0_129 = arith.constant 0 : index
    %c0_130 = arith.constant 0 : index
    %263 = vector.load %arg18[%c1_128, %c0_129, %c0_130] : memref<8x8x128xf32, #tpu.memory_space<vmem>>, vector<1x8x128xf32>
    %264 = vector.shape_cast %263 : vector<1x8x128xf32> to vector<8x128xf32>
    %cst_131 = arith.constant dense<0.000000e+00> : vector<8x128xf32>
    %265 = tpu.matmul %262, %229, %cst_131 {dimension_numbers = #tpu.dot_dimension_numbers<[1], [0], [0], [1], [0, 0, 1, 1], [], []>} : vector<8x32xf32>, vector<32x128xf32>, vector<8x128xf32> -> vector<8x128xf32>
    %266 = arith.addf %264, %265 : vector<8x128xf32>
    %267 = arith.negf %266 : vector<8x128xf32>
    %268 = math.exp %267 : vector<8x128xf32>
    %cst_132 = arith.constant 1.000000e+00 : f32
    %269 = vector.broadcast %cst_132 : f32 to vector<8x128xf32>
    %270 = arith.addf %269, %268 : vector<8x128xf32>
    %271 = arith.divf %269, %270 : vector<8x128xf32>
    %272 = vector.extract_strided_slice %271 {offsets = [0, 0], sizes = [8, 32], strides = [1, 1]} : vector<8x128xf32> to vector<8x32xf32>
    %273 = vector.extract_strided_slice %271 {offsets = [0, 32], sizes = [8, 32], strides = [1, 1]} : vector<8x128xf32> to vector<8x32xf32>
    %274 = vector.extract_strided_slice %271 {offsets = [0, 64], sizes = [8, 32], strides = [1, 1]} : vector<8x128xf32> to vector<8x32xf32>
    %cst_133 = arith.constant 2.000000e+00 : f32
    %275 = vector.broadcast %cst_133 : f32 to vector<8x32xf32>
    %276 = arith.mulf %275, %274 : vector<8x32xf32>
    %cst_134 = arith.constant 1.000000e+00 : f32
    %277 = vector.broadcast %cst_134 : f32 to vector<8x32xf32>
    %278 = arith.subf %276, %277 : vector<8x32xf32>
    %279 = vector.extract_strided_slice %271 {offsets = [0, 96], sizes = [8, 32], strides = [1, 1]} : vector<8x128xf32> to vector<8x32xf32>
    %280 = arith.mulf %273, %260 : vector<8x32xf32>
    %281 = arith.mulf %272, %278 : vector<8x32xf32>
    %282 = arith.addf %280, %281 : vector<8x32xf32>
    %283 = math.tanh %282 : vector<8x32xf32>
    %284 = arith.mulf %279, %283 : vector<8x32xf32>
    %c2_135 = arith.constant 2 : index
    %c0_136 = arith.constant 0 : index
    %c0_137 = arith.constant 0 : index
    %285 = vector.load %arg18[%c2_135, %c0_136, %c0_137] : memref<8x8x128xf32, #tpu.memory_space<vmem>>, vector<1x8x128xf32>
    %286 = vector.shape_cast %285 : vector<1x8x128xf32> to vector<8x128xf32>
    %cst_138 = arith.constant dense<0.000000e+00> : vector<8x128xf32>
    %287 = tpu.matmul %284, %229, %cst_138 {dimension_numbers = #tpu.dot_dimension_numbers<[1], [0], [0], [1], [0, 0, 1, 1], [], []>} : vector<8x32xf32>, vector<32x128xf32>, vector<8x128xf32> -> vector<8x128xf32>
    %288 = arith.addf %286, %287 : vector<8x128xf32>
    %289 = arith.negf %288 : vector<8x128xf32>
    %290 = math.exp %289 : vector<8x128xf32>
    %cst_139 = arith.constant 1.000000e+00 : f32
    %291 = vector.broadcast %cst_139 : f32 to vector<8x128xf32>
    %292 = arith.addf %291, %290 : vector<8x128xf32>
    %293 = arith.divf %291, %292 : vector<8x128xf32>
    %294 = vector.extract_strided_slice %293 {offsets = [0, 0], sizes = [8, 32], strides = [1, 1]} : vector<8x128xf32> to vector<8x32xf32>
    %295 = vector.extract_strided_slice %293 {offsets = [0, 32], sizes = [8, 32], strides = [1, 1]} : vector<8x128xf32> to vector<8x32xf32>
    %296 = vector.extract_strided_slice %293 {offsets = [0, 64], sizes = [8, 32], strides = [1, 1]} : vector<8x128xf32> to vector<8x32xf32>
    %cst_140 = arith.constant 2.000000e+00 : f32
    %297 = vector.broadcast %cst_140 : f32 to vector<8x32xf32>
    %298 = arith.mulf %297, %296 : vector<8x32xf32>
    %cst_141 = arith.constant 1.000000e+00 : f32
    %299 = vector.broadcast %cst_141 : f32 to vector<8x32xf32>
    %300 = arith.subf %298, %299 : vector<8x32xf32>
    %301 = vector.extract_strided_slice %293 {offsets = [0, 96], sizes = [8, 32], strides = [1, 1]} : vector<8x128xf32> to vector<8x32xf32>
    %302 = arith.mulf %295, %282 : vector<8x32xf32>
    %303 = arith.mulf %294, %300 : vector<8x32xf32>
    %304 = arith.addf %302, %303 : vector<8x32xf32>
    %305 = math.tanh %304 : vector<8x32xf32>
    %306 = arith.mulf %301, %305 : vector<8x32xf32>
    %c3_142 = arith.constant 3 : index
    %c0_143 = arith.constant 0 : index
    %c0_144 = arith.constant 0 : index
    %307 = vector.load %arg18[%c3_142, %c0_143, %c0_144] : memref<8x8x128xf32, #tpu.memory_space<vmem>>, vector<1x8x128xf32>
    %308 = vector.shape_cast %307 : vector<1x8x128xf32> to vector<8x128xf32>
    %cst_145 = arith.constant dense<0.000000e+00> : vector<8x128xf32>
    %309 = tpu.matmul %306, %229, %cst_145 {dimension_numbers = #tpu.dot_dimension_numbers<[1], [0], [0], [1], [0, 0, 1, 1], [], []>} : vector<8x32xf32>, vector<32x128xf32>, vector<8x128xf32> -> vector<8x128xf32>
    %310 = arith.addf %308, %309 : vector<8x128xf32>
    %311 = arith.negf %310 : vector<8x128xf32>
    %312 = math.exp %311 : vector<8x128xf32>
    %cst_146 = arith.constant 1.000000e+00 : f32
    %313 = vector.broadcast %cst_146 : f32 to vector<8x128xf32>
    %314 = arith.addf %313, %312 : vector<8x128xf32>
    %315 = arith.divf %313, %314 : vector<8x128xf32>
    %316 = vector.extract_strided_slice %315 {offsets = [0, 0], sizes = [8, 32], strides = [1, 1]} : vector<8x128xf32> to vector<8x32xf32>
    %317 = vector.extract_strided_slice %315 {offsets = [0, 32], sizes = [8, 32], strides = [1, 1]} : vector<8x128xf32> to vector<8x32xf32>
    %318 = vector.extract_strided_slice %315 {offsets = [0, 64], sizes = [8, 32], strides = [1, 1]} : vector<8x128xf32> to vector<8x32xf32>
    %cst_147 = arith.constant 2.000000e+00 : f32
    %319 = vector.broadcast %cst_147 : f32 to vector<8x32xf32>
    %320 = arith.mulf %319, %318 : vector<8x32xf32>
    %cst_148 = arith.constant 1.000000e+00 : f32
    %321 = vector.broadcast %cst_148 : f32 to vector<8x32xf32>
    %322 = arith.subf %320, %321 : vector<8x32xf32>
    %323 = vector.extract_strided_slice %315 {offsets = [0, 96], sizes = [8, 32], strides = [1, 1]} : vector<8x128xf32> to vector<8x32xf32>
    %324 = arith.mulf %317, %304 : vector<8x32xf32>
    %325 = arith.mulf %316, %322 : vector<8x32xf32>
    %326 = arith.addf %324, %325 : vector<8x32xf32>
    %327 = math.tanh %326 : vector<8x32xf32>
    %328 = arith.mulf %323, %327 : vector<8x32xf32>
    %c4_149 = arith.constant 4 : index
    %c0_150 = arith.constant 0 : index
    %c0_151 = arith.constant 0 : index
    %329 = vector.load %arg18[%c4_149, %c0_150, %c0_151] : memref<8x8x128xf32, #tpu.memory_space<vmem>>, vector<1x8x128xf32>
    %330 = vector.shape_cast %329 : vector<1x8x128xf32> to vector<8x128xf32>
    %cst_152 = arith.constant dense<0.000000e+00> : vector<8x128xf32>
    %331 = tpu.matmul %328, %229, %cst_152 {dimension_numbers = #tpu.dot_dimension_numbers<[1], [0], [0], [1], [0, 0, 1, 1], [], []>} : vector<8x32xf32>, vector<32x128xf32>, vector<8x128xf32> -> vector<8x128xf32>
    %332 = arith.addf %330, %331 : vector<8x128xf32>
    %333 = arith.negf %332 : vector<8x128xf32>
    %334 = math.exp %333 : vector<8x128xf32>
    %cst_153 = arith.constant 1.000000e+00 : f32
    %335 = vector.broadcast %cst_153 : f32 to vector<8x128xf32>
    %336 = arith.addf %335, %334 : vector<8x128xf32>
    %337 = arith.divf %335, %336 : vector<8x128xf32>
    %338 = vector.extract_strided_slice %337 {offsets = [0, 0], sizes = [8, 32], strides = [1, 1]} : vector<8x128xf32> to vector<8x32xf32>
    %339 = vector.extract_strided_slice %337 {offsets = [0, 32], sizes = [8, 32], strides = [1, 1]} : vector<8x128xf32> to vector<8x32xf32>
    %340 = vector.extract_strided_slice %337 {offsets = [0, 64], sizes = [8, 32], strides = [1, 1]} : vector<8x128xf32> to vector<8x32xf32>
    %cst_154 = arith.constant 2.000000e+00 : f32
    %341 = vector.broadcast %cst_154 : f32 to vector<8x32xf32>
    %342 = arith.mulf %341, %340 : vector<8x32xf32>
    %cst_155 = arith.constant 1.000000e+00 : f32
    %343 = vector.broadcast %cst_155 : f32 to vector<8x32xf32>
    %344 = arith.subf %342, %343 : vector<8x32xf32>
    %345 = vector.extract_strided_slice %337 {offsets = [0, 96], sizes = [8, 32], strides = [1, 1]} : vector<8x128xf32> to vector<8x32xf32>
    %346 = arith.mulf %339, %326 : vector<8x32xf32>
    %347 = arith.mulf %338, %344 : vector<8x32xf32>
    %348 = arith.addf %346, %347 : vector<8x32xf32>
    %349 = math.tanh %348 : vector<8x32xf32>
    %350 = arith.mulf %345, %349 : vector<8x32xf32>
    %c5_156 = arith.constant 5 : index
    %c0_157 = arith.constant 0 : index
    %c0_158 = arith.constant 0 : index
    %351 = vector.load %arg18[%c5_156, %c0_157, %c0_158] : memref<8x8x128xf32, #tpu.memory_space<vmem>>, vector<1x8x128xf32>
    %352 = vector.shape_cast %351 : vector<1x8x128xf32> to vector<8x128xf32>
    %cst_159 = arith.constant dense<0.000000e+00> : vector<8x128xf32>
    %353 = tpu.matmul %350, %229, %cst_159 {dimension_numbers = #tpu.dot_dimension_numbers<[1], [0], [0], [1], [0, 0, 1, 1], [], []>} : vector<8x32xf32>, vector<32x128xf32>, vector<8x128xf32> -> vector<8x128xf32>
    %354 = arith.addf %352, %353 : vector<8x128xf32>
    %355 = arith.negf %354 : vector<8x128xf32>
    %356 = math.exp %355 : vector<8x128xf32>
    %cst_160 = arith.constant 1.000000e+00 : f32
    %357 = vector.broadcast %cst_160 : f32 to vector<8x128xf32>
    %358 = arith.addf %357, %356 : vector<8x128xf32>
    %359 = arith.divf %357, %358 : vector<8x128xf32>
    %360 = vector.extract_strided_slice %359 {offsets = [0, 0], sizes = [8, 32], strides = [1, 1]} : vector<8x128xf32> to vector<8x32xf32>
    %361 = vector.extract_strided_slice %359 {offsets = [0, 32], sizes = [8, 32], strides = [1, 1]} : vector<8x128xf32> to vector<8x32xf32>
    %362 = vector.extract_strided_slice %359 {offsets = [0, 64], sizes = [8, 32], strides = [1, 1]} : vector<8x128xf32> to vector<8x32xf32>
    %cst_161 = arith.constant 2.000000e+00 : f32
    %363 = vector.broadcast %cst_161 : f32 to vector<8x32xf32>
    %364 = arith.mulf %363, %362 : vector<8x32xf32>
    %cst_162 = arith.constant 1.000000e+00 : f32
    %365 = vector.broadcast %cst_162 : f32 to vector<8x32xf32>
    %366 = arith.subf %364, %365 : vector<8x32xf32>
    %367 = vector.extract_strided_slice %359 {offsets = [0, 96], sizes = [8, 32], strides = [1, 1]} : vector<8x128xf32> to vector<8x32xf32>
    %368 = arith.mulf %361, %348 : vector<8x32xf32>
    %369 = arith.mulf %360, %366 : vector<8x32xf32>
    %370 = arith.addf %368, %369 : vector<8x32xf32>
    %371 = math.tanh %370 : vector<8x32xf32>
    %372 = arith.mulf %367, %371 : vector<8x32xf32>
    %c6_163 = arith.constant 6 : index
    %c0_164 = arith.constant 0 : index
    %c0_165 = arith.constant 0 : index
    %373 = vector.load %arg18[%c6_163, %c0_164, %c0_165] : memref<8x8x128xf32, #tpu.memory_space<vmem>>, vector<1x8x128xf32>
    %374 = vector.shape_cast %373 : vector<1x8x128xf32> to vector<8x128xf32>
    %cst_166 = arith.constant dense<0.000000e+00> : vector<8x128xf32>
    %375 = tpu.matmul %372, %229, %cst_166 {dimension_numbers = #tpu.dot_dimension_numbers<[1], [0], [0], [1], [0, 0, 1, 1], [], []>} : vector<8x32xf32>, vector<32x128xf32>, vector<8x128xf32> -> vector<8x128xf32>
    %376 = arith.addf %374, %375 : vector<8x128xf32>
    %377 = arith.negf %376 : vector<8x128xf32>
    %378 = math.exp %377 : vector<8x128xf32>
    %cst_167 = arith.constant 1.000000e+00 : f32
    %379 = vector.broadcast %cst_167 : f32 to vector<8x128xf32>
    %380 = arith.addf %379, %378 : vector<8x128xf32>
    %381 = arith.divf %379, %380 : vector<8x128xf32>
    %382 = vector.extract_strided_slice %381 {offsets = [0, 0], sizes = [8, 32], strides = [1, 1]} : vector<8x128xf32> to vector<8x32xf32>
    %383 = vector.extract_strided_slice %381 {offsets = [0, 32], sizes = [8, 32], strides = [1, 1]} : vector<8x128xf32> to vector<8x32xf32>
    %384 = vector.extract_strided_slice %381 {offsets = [0, 64], sizes = [8, 32], strides = [1, 1]} : vector<8x128xf32> to vector<8x32xf32>
    %cst_168 = arith.constant 2.000000e+00 : f32
    %385 = vector.broadcast %cst_168 : f32 to vector<8x32xf32>
    %386 = arith.mulf %385, %384 : vector<8x32xf32>
    %cst_169 = arith.constant 1.000000e+00 : f32
    %387 = vector.broadcast %cst_169 : f32 to vector<8x32xf32>
    %388 = arith.subf %386, %387 : vector<8x32xf32>
    %389 = vector.extract_strided_slice %381 {offsets = [0, 96], sizes = [8, 32], strides = [1, 1]} : vector<8x128xf32> to vector<8x32xf32>
    %390 = arith.mulf %383, %370 : vector<8x32xf32>
    %391 = arith.mulf %382, %388 : vector<8x32xf32>
    %392 = arith.addf %390, %391 : vector<8x32xf32>
    %393 = math.tanh %392 : vector<8x32xf32>
    %394 = arith.mulf %389, %393 : vector<8x32xf32>
    %c7_170 = arith.constant 7 : index
    %c0_171 = arith.constant 0 : index
    %c0_172 = arith.constant 0 : index
    %395 = vector.load %arg18[%c7_170, %c0_171, %c0_172] : memref<8x8x128xf32, #tpu.memory_space<vmem>>, vector<1x8x128xf32>
    %396 = vector.shape_cast %395 : vector<1x8x128xf32> to vector<8x128xf32>
    %cst_173 = arith.constant dense<0.000000e+00> : vector<8x128xf32>
    %397 = tpu.matmul %394, %229, %cst_173 {dimension_numbers = #tpu.dot_dimension_numbers<[1], [0], [0], [1], [0, 0, 1, 1], [], []>} : vector<8x32xf32>, vector<32x128xf32>, vector<8x128xf32> -> vector<8x128xf32>
    %398 = arith.addf %396, %397 : vector<8x128xf32>
    %399 = arith.negf %398 : vector<8x128xf32>
    %400 = math.exp %399 : vector<8x128xf32>
    %cst_174 = arith.constant 1.000000e+00 : f32
    %401 = vector.broadcast %cst_174 : f32 to vector<8x128xf32>
    %402 = arith.addf %401, %400 : vector<8x128xf32>
    %403 = arith.divf %401, %402 : vector<8x128xf32>
    %404 = vector.extract_strided_slice %403 {offsets = [0, 0], sizes = [8, 32], strides = [1, 1]} : vector<8x128xf32> to vector<8x32xf32>
    %405 = vector.extract_strided_slice %403 {offsets = [0, 32], sizes = [8, 32], strides = [1, 1]} : vector<8x128xf32> to vector<8x32xf32>
    %406 = vector.extract_strided_slice %403 {offsets = [0, 64], sizes = [8, 32], strides = [1, 1]} : vector<8x128xf32> to vector<8x32xf32>
    %cst_175 = arith.constant 2.000000e+00 : f32
    %407 = vector.broadcast %cst_175 : f32 to vector<8x32xf32>
    %408 = arith.mulf %407, %406 : vector<8x32xf32>
    %cst_176 = arith.constant 1.000000e+00 : f32
    %409 = vector.broadcast %cst_176 : f32 to vector<8x32xf32>
    %410 = arith.subf %408, %409 : vector<8x32xf32>
    %411 = vector.extract_strided_slice %403 {offsets = [0, 96], sizes = [8, 32], strides = [1, 1]} : vector<8x128xf32> to vector<8x32xf32>
    %412 = arith.mulf %405, %392 : vector<8x32xf32>
    %413 = arith.mulf %404, %410 : vector<8x32xf32>
    %414 = arith.addf %412, %413 : vector<8x32xf32>
    %415 = math.tanh %414 : vector<8x32xf32>
    %416 = arith.mulf %411, %415 : vector<8x32xf32>
    %c1_177 = arith.constant 1 : index
    %c0_178 = arith.constant 0 : index
    %c0_179 = arith.constant 0 : index
    %417 = vector.load %arg15[%c1_177, %c0_178, %c0_179] : memref<2x8x32xf32, #tpu.memory_space<vmem>>, vector<1x8x32xf32>
    %418 = vector.shape_cast %417 : vector<1x8x32xf32> to vector<8x32xf32>
    %419 = vector.shape_cast %416 : vector<8x32xf32> to vector<1x8x32xf32>
    tpu.vector_store %arg15[%c1_177, %c0_178, %c0_179], %419 {strides = array<i32>} : memref<2x8x32xf32, #tpu.memory_space<vmem>>, vector<1x8x32xf32>,
    %c1_180 = arith.constant 1 : index
    %c0_181 = arith.constant 0 : index
    %c0_182 = arith.constant 0 : index
    %420 = vector.load %arg16[%c1_180, %c0_181, %c0_182] : memref<2x8x32xf32, #tpu.memory_space<vmem>>, vector<1x8x32xf32>
    %421 = vector.shape_cast %420 : vector<1x8x32xf32> to vector<8x32xf32>
    %422 = vector.shape_cast %414 : vector<8x32xf32> to vector<1x8x32xf32>
    tpu.vector_store %arg16[%c1_180, %c0_181, %c0_182], %422 {strides = array<i32>} : memref<2x8x32xf32, #tpu.memory_space<vmem>>, vector<1x8x32xf32>,
    %c0_183 = arith.constant 0 : index
    %c0_184 = arith.constant 0 : index
    %423 = vector.load %arg12[%c0_183, %c0_184] : memref<32x2xf32, #tpu.memory_space<vmem>>, vector<32x2xf32>
    %cst_185 = arith.constant dense<0.000000e+00> : vector<8x2xf32>
    %424 = tpu.matmul %416, %423, %cst_185 {dimension_numbers = #tpu.dot_dimension_numbers<[1], [0], [0], [1], [0, 0, 1, 1], [], []>} : vector<8x32xf32>, vector<32x2xf32>, vector<8x2xf32> -> vector<8x2xf32>
    %c0_186 = arith.constant 0 : index
    %c0_187 = arith.constant 0 : index
    %425 = vector.load %arg13[%c0_186, %c0_187] : memref<1x2xf32, #tpu.memory_space<vmem>>, vector<1x2xf32>
    %426 = vector.broadcast %425 : vector<1x2xf32> to vector<8x2xf32>
    %427 = arith.addf %424, %426 : vector<8x2xf32>
    %c0_188 = arith.constant 0 : index
    %c0_189 = arith.constant 0 : index
    %428 = vector.load %arg14[%c0_188, %c0_189] : memref<8x2xf32, #tpu.memory_space<vmem>>, vector<8x2xf32>
    tpu.vector_store %arg14[%c0_188, %c0_189], %427 {strides = array<i32>} : memref<8x2xf32, #tpu.memory_space<vmem>>, vector<8x2xf32>,
    return
  }
  func.func @transform_0(%arg0: i32) -> (i32, i32, i32) {
    %c0_i32 = arith.constant 0 : i32
    %c0_i32_0 = arith.constant 0 : i32
    %c0_i32_1 = arith.constant 0 : i32
    return %c0_i32, %arg0, %c0_i32_0 : i32, i32, i32
  }
  func.func @transform_1(%arg0: i32) -> (i32, i32, i32) {
    %c0_i32 = arith.constant 0 : i32
    %c0_i32_0 = arith.constant 0 : i32
    %c0_i32_1 = arith.constant 0 : i32
    return %c0_i32, %arg0, %c0_i32_0 : i32, i32, i32
  }
  func.func @transform_2(%arg0: i32) -> (i32, i32, i32) {
    %c0_i32 = arith.constant 0 : i32
    %c0_i32_0 = arith.constant 0 : i32
    %c0_i32_1 = arith.constant 0 : i32
    return %c0_i32, %arg0, %c0_i32_0 : i32, i32, i32
  }
  func.func @transform_3(%arg0: i32) -> (i32, i32) {
    %c0_i32 = arith.constant 0 : i32
    %c0_i32_0 = arith.constant 0 : i32
    %c0_i32_1 = arith.constant 0 : i32
    return %c0_i32, %c0_i32_0 : i32, i32
  }
  func.func @transform_4(%arg0: i32) -> (i32, i32) {
    %c0_i32 = arith.constant 0 : i32
    %c0_i32_0 = arith.constant 0 : i32
    %c0_i32_1 = arith.constant 0 : i32
    return %c0_i32, %c0_i32_0 : i32, i32
  }
  func.func @transform_5(%arg0: i32) -> (i32, i32) {
    %c0_i32 = arith.constant 0 : i32
    %c0_i32_0 = arith.constant 0 : i32
    %c0_i32_1 = arith.constant 0 : i32
    return %c0_i32, %c0_i32_0 : i32, i32
  }
  func.func @transform_6(%arg0: i32) -> (i32, i32) {
    %c0_i32 = arith.constant 0 : i32
    %c0_i32_0 = arith.constant 0 : i32
    %c0_i32_1 = arith.constant 0 : i32
    return %c0_i32, %c0_i32_0 : i32, i32
  }
  func.func @transform_7(%arg0: i32) -> (i32, i32) {
    %c0_i32 = arith.constant 0 : i32
    %c0_i32_0 = arith.constant 0 : i32
    %c0_i32_1 = arith.constant 0 : i32
    return %c0_i32, %c0_i32_0 : i32, i32
  }
  func.func @transform_8(%arg0: i32) -> (i32, i32) {
    %c0_i32 = arith.constant 0 : i32
    %c0_i32_0 = arith.constant 0 : i32
    %c0_i32_1 = arith.constant 0 : i32
    return %c0_i32, %c0_i32_0 : i32, i32
  }
  func.func @transform_9(%arg0: i32) -> (i32, i32) {
    %c0_i32 = arith.constant 0 : i32
    %c0_i32_0 = arith.constant 0 : i32
    %c0_i32_1 = arith.constant 0 : i32
    return %c0_i32, %c0_i32_0 : i32, i32
  }
  func.func @transform_10(%arg0: i32) -> (i32, i32) {
    %c0_i32 = arith.constant 0 : i32
    %c0_i32_0 = arith.constant 0 : i32
    %c0_i32_1 = arith.constant 0 : i32
    return %c0_i32, %c0_i32_0 : i32, i32
  }
  func.func @transform_11(%arg0: i32) -> (i32, i32) {
    %c0_i32 = arith.constant 0 : i32
    %c0_i32_0 = arith.constant 0 : i32
    %c0_i32_1 = arith.constant 0 : i32
    return %c0_i32, %c0_i32_0 : i32, i32
  }
  func.func @transform_12(%arg0: i32) -> (i32, i32) {
    %c0_i32 = arith.constant 0 : i32
    %c0_i32_0 = arith.constant 0 : i32
    %c0_i32_1 = arith.constant 0 : i32
    return %c0_i32, %c0_i32_0 : i32, i32
  }
  func.func @transform_13(%arg0: i32) -> (i32, i32) {
    %c0_i32 = arith.constant 0 : i32
    %c0_i32_0 = arith.constant 0 : i32
    return %arg0, %c0_i32 : i32, i32
  }
  func.func @transform_14(%arg0: i32) -> (i32, i32, i32) {
    %c0_i32 = arith.constant 0 : i32
    %c0_i32_0 = arith.constant 0 : i32
    %c0_i32_1 = arith.constant 0 : i32
    return %c0_i32, %arg0, %c0_i32_0 : i32, i32, i32
  }
  func.func @transform_15(%arg0: i32) -> (i32, i32, i32) {
    %c0_i32 = arith.constant 0 : i32
    %c0_i32_0 = arith.constant 0 : i32
    %c0_i32_1 = arith.constant 0 : i32
    return %c0_i32, %arg0, %c0_i32_0 : i32, i32, i32
  }
}

</mosaic_0001>

<bundles_post_ra>
// kernel: tpu_custom_call.1
= control target key start
LH: loop header
LB: loop body
LE: loop exit
PB: predicated region body
PF: predicated region fallthrough
CT: control target
= control target key end

     0   :  { %21 = vsyncpa [#allocation5], 0  ;;  %s3718_s0 = inlined_call_operand.vmem [shape: f32[8,8,4], index: 0, kind: input, shape index: {}]   ;;  %s3719_s1 = inlined_call_operand.hbm [shape: f32[2,8,32], index: 1, kind: input, shape index: {}]   ;;  %s3720_s2 = inlined_call_operand.hbm [shape: f32[2,8,32], index: 2, kind: input, shape index: {}]   ;;  %s3721_s3 = inlined_call_operand.hbm [shape: f32[4,16], index: 3, kind: input, shape index: {}]   ;;  %s3722_s4 = inlined_call_operand.vmem [shape: f32[1,16], index: 4, kind: input, shape index: {}]   ;;  %s3723_s5 = inlined_call_operand.vmem [shape: f32[16,128], index: 5, kind: input, shape index: {}]   ;;  %s3724_s6 = inlined_call_operand.vmem [shape: f32[32,128], index: 6, kind: input, shape index: {}]   ;;  %s3725_s7 = inlined_call_operand.vmem [shape: f32[1,128], index: 7, kind: input, shape index: {}]   ;;  %s3726_s8 = inlined_call_operand.vmem [shape: f32[32,128], index: 8, kind: input, shape index: {}]   ;;  %s3727_s9 = inlined_call_operand.vmem [shape: f32[32,128], index: 9, kind: input, shape index: {}]   ;;  %s3728_s10 = inlined_call_operand.vmem [shape: f32[1,128], index: 10, kind: input, shape index: {}]   ;;  %s3729_s11 = inlined_call_operand.vmem [shape: f32[32,2], index: 11, kind: input, shape index: {}]   ;;  %s3730_s12 = inlined_call_operand.vmem [shape: f32[1,2], index: 12, kind: input, shape index: {}]   ;;  %s3731_s13 = inlined_call_operand.vmem [shape: f32[8,2], index: 13, kind: output, shape index: {0}]   ;;  %s3732_s14 = inlined_call_operand.hbm [shape: f32[2,8,32], index: 14, kind: output, shape index: {1}]   ;;  %s3733_s15 = inlined_call_operand.hbm [shape: f32[2,8,32], index: 15, kind: output, shape index: {2}]  }
   0x1   :  { %22 = vsyncpa [#allocation8], 0 }
   0x2   :  { %23 = vsyncpa [#allocation6], 0 }
   0x3   :  { %24 = vsyncpa [#allocation12], 0  ;;  %s3148_s18 = smov [#allocation7]   ;;  %s3149_s20 = smov [#allocation4]  }
   0x4   :  { %s44_s19 = sshll.u32 %s3148_s18, 4  ;;  %s32_s21 = sshll.u32 %s3149_s20, 4  ;;  %s45_s19 = int_to_ptr.vmem [resolvable:$true] %s44_s19  ;;  %s3241_s21 = int_to_ptr.vmem [resolvable:$true] %s32_s21 }
   0x5   :  { %s3030_s24 = scalar_lea.hbm %s3720_s2, 256 }
   0x6   :  { %p3031_p0 = scmp.ne.s32.totalorder %s3720_s2, %s3030_s24  ;;  %p3034_p1 = scmp.lt.u32.totalorder %s3030_s24, %s3720_s2 }
   0x8   :  { %p3036_p2 = pnand %p3034_p1, %p3031_p0 }
   0xa   :  { %3039 = shalt.err (!%p3036_p2)
}
   0xb   :  { %s3040_s29 = scalar_lea.vmem %s45_s19, 256  ;;  %p3045_p4 = scmp.lt.s32.totalorder %s45_s19, %s45_s19 }
   0xc   :  { %p3041_p3 = scmp.ne.s32.totalorder %s45_s19, %s3040_s29  ;;  %p3046_p5 = scmp.lt.s32.totalorder %s3040_s29, %s3040_s29 }
   0xe   :  { %p3047_p6 = por %p3046_p5, %p3045_p4 }
  0x10   :  { %p3048_p7 = pnand %p3047_p6, %p3041_p3 }
  0x12   :  { %3051 = shalt.err (!%p3048_p7)
}
  0x13   :  { %s3150_s30 = smov 128   ;;  %s3151_s16 = smov 8  }
  0x14   :  { %50 = dma.hbm_to_vmem [thread:$0]  %s3720_s2, 256, %s45_s19, [#allocation8], %s3150_s30, %s3150_s30, %s3151_s16  }
  0x15   :  { %s3052_s23 = scalar_lea.hbm %s3719_s1, 256 }
  0x16   :  { %p3053_p8 = scmp.ne.s32.totalorder %s3719_s1, %s3052_s23  ;;  %p3056_p9 = scmp.lt.u32.totalorder %s3052_s23, %s3719_s1 }
  0x18   :  { %p3058_p10 = pnand %p3056_p9, %p3053_p8 }
  0x1a   :  { %3061 = shalt.err (!%p3058_p10)
}
  0x1b   :  { %s3062_s28 = scalar_lea.vmem %s3241_s21, 256  ;;  %p3067_p12 = scmp.lt.s32.totalorder %s3241_s21, %s3241_s21 }
  0x1c   :  { %p3063_p11 = scmp.ne.s32.totalorder %s3241_s21, %s3062_s28  ;;  %p3068_p13 = scmp.lt.s32.totalorder %s3062_s28, %s3062_s28 }
  0x1e   :  { %p3069_p0 = por %p3068_p13, %p3067_p12 }
  0x20   :  { %p3070_p1 = pnand %p3069_p0, %p3063_p11 }
  0x22   :  { %3073 = shalt.err (!%p3070_p1)
}
  0x23   :  { %38 = dma.hbm_to_vmem [thread:$0]  %s3719_s1, 256, %s3241_s21, [#allocation5], %s3150_s30, %s3150_s30, %s3151_s16  }
  0x24   :  { %s3152_s29 = smov [#allocation9]   ;;  %s3074_s22 = scalar_lea.hbm %s3721_s3, 64 }
  0x25   :  { %s57_s17 = sshll.u32 %s3152_s29, 4  ;;  %p3075_p2 = scmp.ne.s32.totalorder %s3721_s3, %s3074_s22  ;;  %s58_s17 = int_to_ptr.vmem [resolvable:$true] %s57_s17 }
  0x26   :  { %p3078_p3 = scmp.lt.u32.totalorder %s3074_s22, %s3721_s3 }
  0x28   :  { %p3080_p4 = pnand %p3078_p3, %p3075_p2 }
  0x2a   :  { %3083 = shalt.err (!%p3080_p4)
}
  0x2b   :  { %s3084_s27 = scalar_lea.vmem %s58_s17, 64  ;;  %p3089_p6 = scmp.lt.s32.totalorder %s58_s17, %s58_s17 }
  0x2c   :  { %p3085_p5 = scmp.ne.s32.totalorder %s58_s17, %s3084_s27  ;;  %p3090_p7 = scmp.lt.s32.totalorder %s3084_s27, %s3084_s27 }
  0x2e   :  { %p3091_p8 = por %p3090_p7, %p3089_p6 }
  0x30   :  { %p3092_p9 = pnand %p3091_p8, %p3085_p5 }
  0x32   :  { %3095 = shalt.err (!%p3092_p9)
}
  0x33   :  { %60 = dma.hbm_to_vmem [thread:$0]  %s3721_s3, 64, %s58_s17, [#allocation8]  }
  0x34   :  { %3140 = dma.done.wait [#allocation5], 256  }
  0x35   :  { %3141 = vsyncadd [#allocation5], 4294967040 }
  0x36   :  { %3142 = dma.done.wait [#allocation8], 320  }
  0x37   :  { %3143 = vsyncadd [#allocation8], 4294966976  ;;  %vm129_vm0 = vcmask 1043456   ;;  %vm104_vm1 = vcmask 31744   ;;  %v96_v0 = vld [vmem:[#allocation9] sm:$0xf] }
  0x38   :  { %v88_v1 = vld [vmem:[%s3718_s0] sm:$0xff]  ;;  %v89_v2 = vld [vmem:[%s3718_s0 + $0x8] sm:$0xff]  ;;  %2568 = vmatprep.subr.msk.mxu0 %vm129_vm0, %v96_v0  ;;  %v90_v3 = vld [vmem:[%s3718_s0 + $0x10] sm:$0xff]  ;;  %2919 = vmatprep.subr.msk.mxu1 %vm129_vm0, %v96_v0  ;;  %v3153_v6 = vmov 0.0|0.0   ;;  %vm400_vm2 = vcmask 261120   ;;  %vm3154_vm3 = vmmov 0  }
  0x39   :  { %2570 = vmatprep.mubr.msk.f32.mxu0 %vm104_vm1, %v88_v1  ;;  %2569 = vmatpush3.msk.msra.mxu0 %vm129_vm0, %v96_v0  ;;  %v246_v4 = vld [vmem:[%s3724_s6] sm:$0xff]  ;;  %v247_v5 = vld [vmem:[%s3724_s6 + $0x8] sm:$0xff]  ;;  %v94_v8 = vld [vmem:[%s3718_s0 + $0x30] sm:$0xff]  ;;  %v3155_v20 = vmov 0.0   ;;  %vm259_vm4 = vcmask 130048   ;;  %s3157_s26 = smov 32  }
  0x3a   :  { %2571 = vmatmul.mubr.msk.f32.vlgmr.msra.gmra.mrb[0].mxu0 %vm104_vm1, %v89_v2  ;;  %2809 = vmatprep.subr.bf16.mxu0 %v3153_v6  ;;  %v3311_v7 = vpack.c.bf16 %v247_v5, %v246_v4  ;;  %v91_v9 = vld [vmem:[%s3718_s0 + $0x18] sm:$0xff]  ;;  %v92_v10 = vld [vmem:[%s3718_s0 + $0x20] sm:$0xff]  ;;  %v93_v11 = vld [vmem:[%s3718_s0 + $0x28] sm:$0xff]  ;;  %s3158_s2 = smov 96   ;;  %s3160_s19 = smov [#allocation11]  }
  0x3b   :  { %2573 = vmatprep.mubr.msk.f32.mxu0 %vm104_vm1, %v90_v3  ;;  %2920 = vmatpush3.msk.msra.mxu1 %vm129_vm0, %v96_v0  ;;  %v95_v12 = vld [vmem:[%s3718_s0 + $0x38] sm:$0xff]  ;;  %v250_v13 = vld [vmem:[%s3723_s5] sm:$0xff]  ;;  %v251_v14 = vld [vmem:[%s3723_s5 + $0x8] sm:$0xff]  ;;  %s2355_s29 = sshll.u32 %s3160_s19, 4  ;;  %s3675_s29 = int_to_ptr.vmem [resolvable:$true] %s2355_s29 }
  0x3c   :  { %2811 = vmatpush3.bf16.msra.mxu0 %v3311_v7  ;;  %2579 = vmatprep.mubr.msk.f32.mxu1 %vm104_vm1, %v94_v8  ;;  %v2805_v15 = vpack.c.bf16 %v251_v14, %v250_v13  ;;  %v248_v16 = vld [vmem:[%s3724_s6 + $0x10] sm:$0xff]  ;;  %v249_v17 = vld [vmem:[%s3724_s6 + $0x18] sm:$0xff]  ;;  %v397_v19 = vld [vmem:[#allocation4] sm:$0xff] }
  0x3d   :  { %2812 = vmatprep.subr.bf16.mxu0 %v3153_v6  ;;  %2580 = vmatmul.mubr.msk.f32.vlgmr.msra.gmra.mrb[0].mxu1 %vm104_vm1, %v95_v12  ;;  %v3349_v18 = vpack.c.bf16 %v249_v17, %v248_v16  ;;  %v2374_v21 = vld [vmem:[%s3722_s4] ss:$0 sm:$0xff]  ;;  %v398_v63 = vld [vmem:[#allocation7] sm:$0xff] }
  0x3e   :  { %2574 = vmatmul.mubr.msk.f32.gmra.mrb[2].mxu0 %vm104_vm1, %v91_v9  ;;  %2806 = vmatprep.subr.bf16.mxu1 %v2805_v15  ;;  %v3383_v48 = vld [vmem:[%s3725_s7] ss:$0 sm:$0xff]  ;;  %s3156_s7 = smov 64  }
  0x3f   :  { %2576 = vmatprep.mubr.msk.f32.mxu0 %vm104_vm1, %v92_v10  ;;  %2808 = vmatpush3.bf16.msra.mxu1 %v2805_v15 }
  0x40   :  { %2815 = vmatprep.subr.bf16.mxu1 %v3153_v6  ;;  %2814 = vmatpush3.bf16.msra.mxu0 %v3349_v18 }
  0x41   :  { %2821 = vmatprep.subr.bf16.mxu0 %v3153_v6 }
  0x42   :  { %2577 = vmatmul.mubr.msk.f32.gmra.mrb[4].mxu0 %vm104_vm1, %v93_v11 }
  0x43   :  { %2606 = vmatprep.mubr.msk.f32.mxu0 %vm3154_vm3, %v3155_v20 }
  0x46   :  { %2607 = vmatmul.mubr.msk.f32.vlgmr.msra.gmra.mrb[6].mxu0 %vm400_vm2, %v397_v19 }
  0x47   :  { %2823 = vmatpush3.bf16.msra.mxu0 %v3311_v7  ;;  %2628 = vmatprep.mubr.msk.f32.mxu0 %vm3154_vm3, %v3155_v20 }
  0x48   :  { %2824 = vmatprep.subr.bf16.mxu0 %v3153_v6 }
  0x4b   :  { %2826 = vmatpush3.bf16.msra.mxu0 %v3349_v18 }
  0x4c   :  { %2833 = vmatprep.subr.bf16.mxu0 %v3153_v6 }
 0x10d   :  { %v2572_v22 = vpop.f32.mrb[0].mxu0 }
 0x10e   :  { %v205_v23 = vadd.f32 %v2572_v22, %v2374_v21  ;;  %v199_v24 = vpop.f32.mrb[1].mxu0 }
 0x10f   :  { %v200_v25 = vadd.f32 %v2374_v21, %v199_v24 }
 0x110   :  { %v239_v28 = vmax.f32 %v205_v23, 0.0  ;;  %v2581_v40 = vpop.f32.mrb[0].mxu1 }
 0x111   :  { %v238_v26 = vmax.f32 %v200_v25, 0.0  ;;  %v2575_v27 = vpop.f32.mrb[2].mxu0  ;;  %v235_v41 = vadd.f32 %v2581_v40, %v2374_v21  ;;  %v229_v42 = vpop.f32.mrb[1].mxu1 }
 0x112   :  { %v215_v29 = vadd.f32 %v2575_v27, %v2374_v21  ;;  %v209_v30 = vpop.f32.mrb[3].mxu0  ;;  %v230_v43 = vadd.f32 %v2374_v21, %v229_v42 }
 0x113   :  { %2586 = vmatprep.mubr.msk.f32.mxu1 %vm259_vm4, %v238_v26  ;;  %v210_v31 = vadd.f32 %v2374_v21, %v209_v30  ;;  %v245_v44 = vmax.f32 %v235_v41, 0.0 }
 0x114   :  { %2587 = vmatmul.mubr.msk.f32.vlgmr.msra.gmra.mrb[2].mxu1 %vm259_vm4, %v239_v28  ;;  %v241_v32 = vmax.f32 %v215_v29, 0.0  ;;  %v244_v45 = vmax.f32 %v230_v43, 0.0 }
 0x115   :  { %v240_v33 = vmax.f32 %v210_v31, 0.0  ;;  %v2578_v34 = vpop.f32.mrb[4].mxu0  ;;  %2817 = vmatpush3.bf16.msra.mxu1 %v3311_v7 }
 0x116   :  { %v225_v35 = vadd.f32 %v2578_v34, %v2374_v21  ;;  %v219_v36 = vpop.f32.mrb[5].mxu0  ;;  %2818 = vmatprep.subr.bf16.mxu1 %v3153_v6 }
 0x117   :  { %v220_v37 = vadd.f32 %v2374_v21, %v219_v36  ;;  %2589 = vmatprep.mubr.msk.f32.mxu1 %vm259_vm4, %v240_v33 }
 0x118   :  { %v243_v38 = vmax.f32 %v225_v35, 0.0  ;;  %2590 = vmatmul.mubr.msk.f32.gmra.mrb[4].mxu1 %vm259_vm4, %v241_v32 }
 0x119   :  { %v242_v39 = vmax.f32 %v220_v37, 0.0  ;;  %2820 = vmatpush3.bf16.msra.mxu1 %v3349_v18  ;;  %v470_v46 = vpop.f32.mrb[6].mxu0 }
 0x11a   :  { %2827 = vmatprep.subr.bf16.mxu1 %v3153_v6  ;;  %v2608_v47 = vpop.f32.mrb[7].mxu0 }
 0x11b   :  { %2592 = vmatprep.mubr.msk.f32.mxu1 %vm259_vm4, %v242_v39 }
 0x11c   :  { %2593 = vmatmul.mubr.msk.f32.gmra.mrb[6].mxu1 %vm259_vm4, %v243_v38 }
 0x11d   :  { %2595 = vmatprep.mubr.msk.f32.mxu1 %vm259_vm4, %v244_v45 }
 0x120   :  { %2596 = vmatmul.mubr.msk.f32.gmra.mrb[8].mxu1 %vm259_vm4, %v245_v44 }
 0x121   :  { %2617 = vmatprep.mubr.msk.f32.mxu1 %vm3154_vm3, %v3155_v20 }
 0x1e7   :  { %v2588_v49 = vpop.f32.mrb[2].mxu1 }
 0x1e8   :  { %v350_v50 = vpop.f32.mrb[3].mxu1  ;;  %v356_v14 = vadd.f32 %v2588_v49, %v3383_v48 }
 0x1e9   :  { %v351_v51 = vadd.f32 %v3383_v48, %v350_v50 }
 0x1eb   :  { %v474_v52 = vadd.f32 %v470_v46, %v351_v51  ;;  %v3386_v56 = vpop.f32.mrb[4].mxu1 }
 0x1ec   :  { %v3388_v57 = vpop.f32.mrb[5].mxu1 }
 0x1ed   :  { %v2394_v53 = vmul.f32 -1.442695, %v474_v52  ;;  %v361_v35 = vadd.f32 %v3383_v48, %v3388_v57 }
 0x1ef   :  { %2934 = vpow2.f32 %v2394_v53  ;;  %v3390_v58 = vpop.f32.mrb[6].mxu1 }
 0x1f0   :  { %v3392_v59 = vpop.f32.mrb[7].mxu1 }
 0x1f3   :  { %v3396_v0 = vpop.f32.mrb[8].mxu1 }
 0x1f4   :  { %v3398_v1 = vpop.f32.mrb[9].mxu1 }
 0x1f9   :  { %v2935_v54 = vpop.eup %2934 }
 0x1fa   :  { %v478_v55 = vadd.f32 1.0, %v2935_v54 }
 0x1fc   :  { %2936 = vrcp.f32 %v478_v55  ;;  %v366_v55 = vadd.f32 %v3386_v56, %v3383_v48 }
 0x206   :  { %v2937_v60 = vpop.eup %2936 }
 0x207   :  { %v481_v61 = vmul.f32 2.0, %v2937_v60 }
 0x209   :  { %v2395_v62 = vadd.f32 -1.0, %v481_v61 }
 0x20b   :  { %489 = vrot.lane.b32.xlu0 %v2395_v62, %s3156_s7 }
 0x20f   :  { %484 = vrot.lane.b32.xlu0 %v398_v63, %s3157_s26 }
 0x27d   :  { %v490_v2 = vpop.permute.xlu0 %489 }
 0x27e   :  { %v492_v3 = vmul.f32 %v2937_v60, %v490_v2 }
 0x280   :  { %494 = vrot.lane.b32.xlu1 %v492_v3, %s3157_s26 }
 0x281   :  { %v485_v4 = vpop.permute.xlu0 %484 }
 0x282   :  { %v487_v5 = vmul.f32 %v2937_v60, %v485_v4 }
 0x2f2   :  { %v495_v8 = vpop.permute.xlu1 %494 }
 0x2f3   :  { %v497_v9 = vadd.f32 %v495_v8, %v487_v5 }
 0x2f5   :  { %2938 = vtanh.f32 %v497_v9 }
 0x2ff   :  { %v2939_v10 = vpop.eup %2938 }
 0x300   :  { %500 = vrot.lane.b32.xlu1 %v2939_v10, %s3156_s7 }
 0x372   :  { %v501_v11 = vpop.permute.xlu1 %500 }
 0x373   :  { %v503_v12 = vmul.f32 %v2937_v60, %v501_v11 }
 0x375   :  { %505 = vrot.lane.b32.xlu0 %v503_v12, %s3157_s26 }
 0x3e7   :  { %v506_v13 = vpop.permute.xlu0 %505 }
 0x3e8   :  { %508 = vst.msk [vmem:[#allocation2] sm:$0xff] %vm400_vm2, %v506_v13  ;;  %2618 = vmatmul.mubr.msk.f32.vlgmr.msra.gmra.mrb[10].mxu1 %vm400_vm2, %v506_v13 }
 0x3e9   :  { %2829 = vmatpush3.bf16.msra.mxu1 %v3311_v7  ;;  %2639 = vmatprep.mubr.msk.f32.mxu1 %vm3154_vm3, %v3155_v20 }
 0x3ea   :  { %2830 = vmatprep.subr.bf16.mxu1 %v3153_v6 }
 0x3ed   :  { %2832 = vmatpush3.bf16.msra.mxu1 %v3349_v18 }
 0x3ee   :  { %2839 = vmatprep.subr.bf16.mxu1 %v3153_v6 }
 0x4bb   :  { %v579_v15 = vpop.f32.mrb[10].mxu1 }
 0x4bc   :  { %v583_v16 = vadd.f32 %v579_v15, %v356_v14  ;;  %v2619_v17 = vpop.f32.mrb[11].mxu1 }
 0x4be   :  { %v2397_v19 = vmul.f32 -1.442695, %v583_v16  ;;  %v371_v16 = vadd.f32 %v3383_v48, %v3392_v59 }
 0x4c0   :  { %2940 = vpow2.f32 %v2397_v19 }
 0x4ca   :  { %v2941_v21 = vpop.eup %2940 }
 0x4cb   :  { %v587_v22 = vadd.f32 1.0, %v2941_v21 }
 0x4cd   :  { %2942 = vrcp.f32 %v587_v22 }
 0x4d7   :  { %v2943_v23 = vpop.eup %2942 }
 0x4d8   :  { %v590_v24 = vmul.f32 2.0, %v2943_v23  ;;  %v592_v28 = vmul.f32 %v2943_v23, %v497_v9 }
 0x4da   :  { %v2398_v25 = vadd.f32 -1.0, %v590_v24 }
 0x4dc   :  { %594 = vrot.lane.b32.xlu1 %v2398_v25, %s3156_s7 }
 0x54e   :  { %v595_v26 = vpop.permute.xlu1 %594 }
 0x54f   :  { %v597_v27 = vmul.f32 %v2943_v23, %v595_v26 }
 0x551   :  { %599 = vrot.lane.b32.xlu0 %v597_v27, %s3157_s26 }
 0x5c3   :  { %v600_v29 = vpop.permute.xlu0 %599 }
 0x5c4   :  { %v602_v30 = vadd.f32 %v600_v29, %v592_v28 }
 0x5c6   :  { %2944 = vtanh.f32 %v602_v30 }
 0x5d0   :  { %v2945_v31 = vpop.eup %2944 }
 0x5d1   :  { %605 = vrot.lane.b32.xlu1 %v2945_v31, %s3156_s7 }
 0x643   :  { %v606_v32 = vpop.permute.xlu1 %605 }
 0x644   :  { %v608_v33 = vmul.f32 %v2943_v23, %v606_v32 }
 0x646   :  { %610 = vrot.lane.b32.xlu0 %v608_v33, %s3157_s26 }
 0x6b8   :  { %v611_v34 = vpop.permute.xlu0 %610 }
 0x6b9   :  { %614 = vst.msk [vmem:[#allocation2 + $0x8] sm:$0xff] %vm400_vm2, %v611_v34  ;;  %2629 = vmatmul.mubr.msk.f32.vlgmr.msra.gmra.mrb[8].mxu0 %vm400_vm2, %v611_v34 }
 0x6ba   :  { %2835 = vmatpush3.bf16.msra.mxu0 %v3311_v7  ;;  %2650 = vmatprep.mubr.msk.f32.mxu0 %vm3154_vm3, %v3155_v20 }
 0x6bb   :  { %2836 = vmatprep.subr.bf16.mxu0 %v3153_v6 }
 0x6be   :  { %2838 = vmatpush3.bf16.msra.mxu0 %v3349_v18 }
 0x6bf   :  { %2845 = vmatprep.subr.bf16.mxu0 %v3153_v6 }
 0x78c   :  { %v685_v36 = vpop.f32.mrb[8].mxu0 }
 0x78d   :  { %v689_v37 = vadd.f32 %v685_v36, %v361_v35  ;;  %v2630_v38 = vpop.f32.mrb[9].mxu0  ;;  %v376_v36 = vadd.f32 %v3390_v58, %v3383_v48 }
 0x78f   :  { %v2400_v39 = vmul.f32 -1.442695, %v689_v37 }
 0x791   :  { %2946 = vpow2.f32 %v2400_v39 }
 0x79b   :  { %v2947_v40 = vpop.eup %2946 }
 0x79c   :  { %v693_v41 = vadd.f32 1.0, %v2947_v40 }
 0x79e   :  { %2948 = vrcp.f32 %v693_v41 }
 0x7a8   :  { %v2949_v42 = vpop.eup %2948 }
 0x7a9   :  { %v696_v43 = vmul.f32 2.0, %v2949_v42  ;;  %v698_v47 = vmul.f32 %v2949_v42, %v602_v30 }
 0x7ab   :  { %v2401_v44 = vadd.f32 -1.0, %v696_v43 }
 0x7ad   :  { %700 = vrot.lane.b32.xlu1 %v2401_v44, %s3156_s7 }
 0x81f   :  { %v701_v45 = vpop.permute.xlu1 %700 }
 0x820   :  { %v703_v46 = vmul.f32 %v2949_v42, %v701_v45 }
 0x822   :  { %705 = vrot.lane.b32.xlu0 %v703_v46, %s3157_s26 }
 0x894   :  { %v706_v49 = vpop.permute.xlu0 %705 }
 0x895   :  { %v708_v50 = vadd.f32 %v706_v49, %v698_v47  ;;  %v1269_v49 = vld [vmem:[%s3726_s8] sm:$0xff] }
 0x897   :  { %2950 = vtanh.f32 %v708_v50 }
 0x8a1   :  { %v2951_v51 = vpop.eup %2950 }
 0x8a2   :  { %711 = vrot.lane.b32.xlu1 %v2951_v51, %s3156_s7 }
 0x914   :  { %v712_v52 = vpop.permute.xlu1 %711 }
 0x915   :  { %v714_v53 = vmul.f32 %v2949_v42, %v712_v52 }
 0x917   :  { %716 = vrot.lane.b32.xlu0 %v714_v53, %s3157_s26 }
 0x989   :  { %v717_v54 = vpop.permute.xlu0 %716 }
 0x98a   :  { %720 = vst.msk [vmem:[#allocation2 + $0x10] sm:$0xff] %vm400_vm2, %v717_v54  ;;  %2640 = vmatmul.mubr.msk.f32.vlgmr.msra.gmra.mrb[12].mxu1 %vm400_vm2, %v717_v54 }
 0x98b   :  { %2841 = vmatpush3.bf16.msra.mxu1 %v3311_v7  ;;  %2661 = vmatprep.mubr.msk.f32.mxu1 %vm3154_vm3, %v3155_v20 }
 0x98c   :  { %2842 = vmatprep.subr.bf16.mxu1 %v3153_v6 }
 0x98f   :  { %2844 = vmatpush3.bf16.msra.mxu1 %v3349_v18 }
 0x990   :  { %2851 = vmatprep.subr.bf16.mxu1 %v3153_v6 }
 0xa5d   :  { %v791_v57 = vpop.f32.mrb[12].mxu1 }
 0xa5e   :  { %v795_v60 = vadd.f32 %v791_v57, %v366_v55  ;;  %v2641_v61 = vpop.f32.mrb[13].mxu1  ;;  %v1271_v55 = vld [vmem:[%s3726_s8 + $0x10] sm:$0xff]  ;;  %v1272_v57 = vld [vmem:[%s3726_s8 + $0x18] sm:$0xff] }
 0xa60   :  { %v2403_v62 = vmul.f32 -1.442695, %v795_v60  ;;  %v2861_v60 = vpack.c.bf16 %v1272_v57, %v1271_v55 }
 0xa62   :  { %2952 = vpow2.f32 %v2403_v62  ;;  %v1257_v62 = vld [vmem:[#allocation2] sm:$0xff] }
 0xa6c   :  { %v2953_v63 = vpop.eup %2952 }
 0xa6d   :  { %v799_v2 = vadd.f32 1.0, %v2953_v63  ;;  %v1258_v63 = vld [vmem:[#allocation2 + $0x8] sm:$0xff] }
 0xa6f   :  { %2954 = vrcp.f32 %v799_v2  ;;  %v1259_v2 = vld [vmem:[#allocation2 + $0x10] sm:$0xff] }
 0xa79   :  { %v2955_v3 = vpop.eup %2954 }
 0xa7a   :  { %v802_v4 = vmul.f32 2.0, %v2955_v3  ;;  %v804_v10 = vmul.f32 %v2955_v3, %v708_v50  ;;  %v1270_v50 = vld [vmem:[%s3726_s8 + $0x8] sm:$0xff] }
 0xa7b   :  { %v2857_v51 = vpack.c.bf16 %v1270_v50, %v1269_v49 }
 0xa7c   :  { %v2404_v5 = vadd.f32 -1.0, %v802_v4 }
 0xa7e   :  { %806 = vrot.lane.b32.xlu1 %v2404_v5, %s3156_s7 }
 0xaf0   :  { %v807_v8 = vpop.permute.xlu1 %806 }
 0xaf1   :  { %v809_v9 = vmul.f32 %v2955_v3, %v807_v8  ;;  %v381_v8 = vadd.f32 %v3383_v48, %v3398_v1 }
 0xaf3   :  { %811 = vrot.lane.b32.xlu0 %v809_v9, %s3157_s26 }
 0xb65   :  { %v812_v11 = vpop.permute.xlu0 %811 }
 0xb66   :  { %v814_v56 = vadd.f32 %v812_v11, %v804_v10 }
 0xb68   :  { %2956 = vtanh.f32 %v814_v56 }
 0xb72   :  { %v2957_v12 = vpop.eup %2956 }
 0xb73   :  { %817 = vrot.lane.b32.xlu1 %v2957_v12, %s3156_s7 }
 0xbe5   :  { %v818_v13 = vpop.permute.xlu1 %817 }
 0xbe6   :  { %v820_v14 = vmul.f32 %v2955_v3, %v818_v13 }
 0xbe8   :  { %822 = vrot.lane.b32.xlu0 %v820_v14, %s3157_s26 }
 0xc5a   :  { %v823_v15 = vpop.permute.xlu0 %822 }
 0xc5b   :  { %826 = vst.msk [vmem:[#allocation2 + $0x18] sm:$0xff] %vm400_vm2, %v823_v15  ;;  %2651 = vmatmul.mubr.msk.f32.vlgmr.msra.gmra.mrb[10].mxu0 %vm400_vm2, %v823_v15 }
 0xc5c   :  { %2847 = vmatpush3.bf16.msra.mxu0 %v3311_v7  ;;  %2672 = vmatprep.mubr.msk.f32.mxu0 %vm3154_vm3, %v3155_v20 }
 0xc5d   :  { %2848 = vmatprep.subr.bf16.mxu0 %v3153_v6 }
 0xc60   :  { %2850 = vmatpush3.bf16.msra.mxu0 %v3349_v18 }
 0xc61   :  { %2858 = vmatprep.subr.bf16.mxu0 %v2857_v51 }
 0xc62   :  { %v1260_v3 = vld [vmem:[#allocation2 + $0x18] sm:$0xff] }
 0xd2e   :  { %v897_v17 = vpop.f32.mrb[10].mxu0 }
 0xd2f   :  { %v901_v19 = vadd.f32 %v897_v17, %v371_v16  ;;  %v2652_v21 = vpop.f32.mrb[11].mxu0 }
 0xd31   :  { %v2406_v22 = vmul.f32 -1.442695, %v901_v19 }
 0xd33   :  { %2958 = vpow2.f32 %v2406_v22 }
 0xd3d   :  { %v2959_v23 = vpop.eup %2958 }
 0xd3e   :  { %v905_v24 = vadd.f32 1.0, %v2959_v23 }
 0xd40   :  { %2960 = vrcp.f32 %v905_v24 }
 0xd4a   :  { %v2961_v25 = vpop.eup %2960 }
 0xd4b   :  { %v908_v26 = vmul.f32 2.0, %v2961_v25  ;;  %v910_v30 = vmul.f32 %v2961_v25, %v814_v56 }
 0xd4d   :  { %v2407_v27 = vadd.f32 -1.0, %v908_v26 }
 0xd4f   :  { %912 = vrot.lane.b32.xlu1 %v2407_v27, %s3156_s7 }
 0xdc1   :  { %v913_v28 = vpop.permute.xlu1 %912 }
 0xdc2   :  { %v915_v29 = vmul.f32 %v2961_v25, %v913_v28 }
 0xdc4   :  { %917 = vrot.lane.b32.xlu0 %v915_v29, %s3157_s26 }
 0xe36   :  { %v918_v31 = vpop.permute.xlu0 %917 }
 0xe37   :  { %v920_v59 = vadd.f32 %v918_v31, %v910_v30  ;;  %v1265_v30 = vld [vmem:[%s3727_s9] sm:$0xff]  ;;  %v1266_v31 = vld [vmem:[%s3727_s9 + $0x8] sm:$0xff] }
 0xe39   :  { %2962 = vtanh.f32 %v920_v59 }
 0xe43   :  { %v2963_v32 = vpop.eup %2962 }
 0xe44   :  { %923 = vrot.lane.b32.xlu1 %v2963_v32, %s3156_s7  ;;  %v1267_v32 = vld [vmem:[%s3727_s9 + $0x10] sm:$0xff] }
 0xeb6   :  { %v924_v33 = vpop.permute.xlu1 %923 }
 0xeb7   :  { %v926_v34 = vmul.f32 %v2961_v25, %v924_v33  ;;  %v1268_v33 = vld [vmem:[%s3727_s9 + $0x18] sm:$0xff] }
 0xeb9   :  { %928 = vrot.lane.b32.xlu0 %v926_v34, %s3157_s26  ;;  %v3526_v34 = vpack.c.bf16 %v1268_v33, %v1267_v32 }
 0xf2b   :  { %v929_v35 = vpop.permute.xlu0 %928 }
 0xf2c   :  { %932 = vst.msk [vmem:[#allocation2 + $0x20] sm:$0xff] %vm400_vm2, %v929_v35  ;;  %2662 = vmatmul.mubr.msk.f32.vlgmr.msra.gmra.mrb[14].mxu1 %vm400_vm2, %v929_v35 }
 0xf2d   :  { %2853 = vmatpush3.bf16.msra.mxu1 %v3311_v7  ;;  %2683 = vmatprep.mubr.msk.f32.mxu1 %vm3154_vm3, %v3155_v20 }
 0xf2e   :  { %2854 = vmatprep.subr.bf16.mxu1 %v3153_v6 }
 0xf31   :  { %2856 = vmatpush3.bf16.msra.mxu1 %v3349_v18 }
 0xf32   :  { %2865 = vmatprep.subr.bf16.mxu1 %v3153_v6 }
 0xf33   :  { %v1261_v4 = vld [vmem:[#allocation2 + $0x20] sm:$0xff] }
 0xfff   :  { %v1003_v37 = vpop.f32.mrb[14].mxu1 }
0x1000   :  { %v1007_v38 = vadd.f32 %v1003_v37, %v376_v36  ;;  %v2663_v39 = vpop.f32.mrb[15].mxu1  ;;  %v1420_v37 = vld [vmem:[#allocation7 + $0x8] sm:$0xff] }
0x1001   :  { %v1418_v39 = vld [vmem:[#allocation4 + $0x8] sm:$0xff] }
0x1002   :  { %v2409_v40 = vmul.f32 -1.442695, %v1007_v38 }
0x1004   :  { %2964 = vpow2.f32 %v2409_v40 }
0x100e   :  { %v2965_v41 = vpop.eup %2964 }
0x100f   :  { %v1011_v42 = vadd.f32 1.0, %v2965_v41  ;;  %v386_v41 = vadd.f32 %v3396_v0, %v3383_v48 }
0x1011   :  { %2966 = vrcp.f32 %v1011_v42 }
0x101b   :  { %v2967_v7 = vpop.eup %2966 }
0x101c   :  { %v1014_v43 = vmul.f32 2.0, %v2967_v7  ;;  %v1016_v46 = vmul.f32 %v2967_v7, %v920_v59  ;;  %v3516_v59 = vpack.c.bf16 %v1266_v31, %v1265_v30 }
0x101e   :  { %v2410_v44 = vadd.f32 -1.0, %v1014_v43 }
0x1020   :  { %1018 = vrot.lane.b32.xlu1 %v2410_v44, %s3156_s7  ;;  %v3553_v44 = vld [vmem:[%s3728_s10] ss:$0 sm:$0xff] }
0x1092   :  { %v1019_v45 = vpop.permute.xlu1 %1018 }
0x1093   :  { %v1021_v18 = vmul.f32 %v2967_v7, %v1019_v45 }
0x1095   :  { %1023 = vrot.lane.b32.xlu0 %v1021_v18, %s3157_s26 }
0x1107   :  { %v1024_v47 = vpop.permute.xlu0 %1023 }
0x1108   :  { %v1026_v58 = vadd.f32 %v1024_v47, %v1016_v46 }
0x110a   :  { %2968 = vtanh.f32 %v1026_v58 }
0x1114   :  { %v2969_v52 = vpop.eup %2968 }
0x1115   :  { %1029 = vrot.lane.b32.xlu1 %v2969_v52, %s3156_s7 }
0x1187   :  { %v1030_v53 = vpop.permute.xlu1 %1029 }
0x1188   :  { %v1032_v54 = vmul.f32 %v2967_v7, %v1030_v53 }
0x118a   :  { %1034 = vrot.lane.b32.xlu0 %v1032_v54, %s3157_s26 }
0x11fc   :  { %v1035_v61 = vpop.permute.xlu0 %1034 }
0x11fd   :  { %1038 = vst.msk [vmem:[#allocation2 + $0x28] sm:$0xff] %vm400_vm2, %v1035_v61  ;;  %2673 = vmatmul.mubr.msk.f32.vlgmr.msra.gmra.mrb[12].mxu0 %vm400_vm2, %v1035_v61 }
0x11fe   :  { %2860 = vmatpush3.bf16.msra.mxu0 %v2857_v51  ;;  %2694 = vmatprep.mubr.msk.f32.mxu0 %vm400_vm2, %v1257_v62 }
0x11ff   :  { %2862 = vmatprep.subr.bf16.mxu0 %v2861_v60 }
0x1202   :  { %2864 = vmatpush3.bf16.msra.mxu0 %v2861_v60 }
0x1203   :  { %2877 = vmatprep.subr.bf16.mxu0 %v3153_v6 }
0x1204   :  { %v1262_v5 = vld [vmem:[#allocation2 + $0x28] sm:$0xff] }
0x1205   :  { %2695 = vmatmul.mubr.msk.f32.vlgmr.msra.gmra.mrb[14].mxu0 %vm400_vm2, %v1258_v63 }
0x1206   :  { %2697 = vmatprep.mubr.msk.f32.mxu0 %vm400_vm2, %v1259_v2  ;;  %2879 = vmatpush3.bf16.msra.mxu0 %v3516_v59 }
0x1207   :  { %2880 = vmatprep.subr.bf16.mxu0 %v3153_v6 }
0x1209   :  { %2698 = vmatmul.mubr.msk.f32.gmra.mrb[16].mxu0 %vm400_vm2, %v1260_v3 }
0x120a   :  { %2700 = vmatprep.mubr.msk.f32.mxu0 %vm400_vm2, %v1261_v4  ;;  %2882 = vmatpush3.bf16.msra.mxu0 %v3526_v34 }
0x120b   :  { %2889 = vmatprep.subr.bf16.mxu0 %v3153_v6 }
0x120d   :  { %2701 = vmatmul.mubr.msk.f32.gmra.mrb[18].mxu0 %vm400_vm2, %v1262_v5 }
0x12d0   :  { %v1109_v9 = vpop.f32.mrb[12].mxu0 }
0x12d1   :  { %v1113_v10 = vadd.f32 %v1109_v9, %v381_v8  ;;  %v2674_v11 = vpop.f32.mrb[13].mxu0 }
0x12d3   :  { %v2412_v56 = vmul.f32 -1.442695, %v1113_v10 }
0x12d5   :  { %2970 = vpow2.f32 %v2412_v56 }
0x12d8   :  { %v3494_v12 = vpop.f32.mrb[14].mxu0 }
0x12d9   :  { %v1370_v13 = vpop.f32.mrb[15].mxu0 }
0x12da   :  { %v1371_v45 = vadd.f32 %v3553_v44, %v1370_v13 }
0x12dc   :  { %v3496_v14 = vpop.f32.mrb[16].mxu0 }
0x12dd   :  { %v3498_v15 = vpop.f32.mrb[17].mxu0 }
0x12df   :  { %v2971_v16 = vpop.eup %2970 }
0x12e0   :  { %v1117_v17 = vadd.f32 1.0, %v2971_v16  ;;  %v3500_v19 = vpop.f32.mrb[18].mxu0 }
0x12e1   :  { %v3502_v21 = vpop.f32.mrb[19].mxu0 }
0x12e2   :  { %2972 = vrcp.f32 %v1117_v17 }
0x12ec   :  { %v2973_v1 = vpop.eup %2972 }
0x12ed   :  { %v1120_v22 = vmul.f32 2.0, %v2973_v1  ;;  %v1122_v26 = vmul.f32 %v2973_v1, %v1026_v58 }
0x12ef   :  { %v2413_v23 = vadd.f32 -1.0, %v1120_v22 }
0x12f1   :  { %1124 = vrot.lane.b32.xlu1 %v2413_v23, %s3156_s7 }
0x1363   :  { %v1125_v24 = vpop.permute.xlu1 %1124 }
0x1364   :  { %v1127_v25 = vmul.f32 %v2973_v1, %v1125_v24  ;;  %v1376_v24 = vadd.f32 %v3494_v12, %v3553_v44 }
0x1366   :  { %1129 = vrot.lane.b32.xlu0 %v1127_v25, %s3157_s26 }
0x13d8   :  { %v1130_v27 = vpop.permute.xlu0 %1129 }
0x13d9   :  { %v3506_v28 = vadd.f32 %v1130_v27, %v1122_v26 }
0x13db   :  { %2974 = vtanh.f32 %v3506_v28 }
0x13e5   :  { %v2975_v29 = vpop.eup %2974 }
0x13e6   :  { %1135 = vrot.lane.b32.xlu1 %v2975_v29, %s3156_s7 }
0x1458   :  { %v1136_v35 = vpop.permute.xlu1 %1135 }
0x1459   :  { %v1138_v36 = vmul.f32 %v2973_v1, %v1136_v35 }
0x145b   :  { %1140 = vrot.lane.b32.xlu0 %v1138_v36, %s3157_s26 }
0x145f   :  { %1505 = vrot.lane.b32.xlu0 %v1420_v37, %s3157_s26 }
0x14cd   :  { %v1141_v38 = vpop.permute.xlu0 %1140 }
0x14ce   :  { %1144 = vst.msk [vmem:[#allocation2 + $0x30] sm:$0xff] %vm400_vm2, %v1141_v38  ;;  %2684 = vmatmul.mubr.msk.f32.vlgmr.msra.gmra.mrb[16].mxu1 %vm400_vm2, %v1141_v38 }
0x14cf   :  { %2867 = vmatpush3.bf16.msra.mxu1 %v3516_v59  ;;  %2714 = vmatprep.mubr.msk.f32.mxu1 %vm3154_vm3, %v3155_v20 }
0x14d0   :  { %2868 = vmatprep.subr.bf16.mxu1 %v3153_v6 }
0x14d1   :  { %v1506_v60 = vpop.permute.xlu0 %1505 }
0x14d3   :  { %2870 = vmatpush3.bf16.msra.mxu1 %v3526_v34 }
0x14d4   :  { %2871 = vmatprep.subr.bf16.mxu1 %v3153_v6 }
0x14d5   :  { %v1263_v40 = vld [vmem:[#allocation2 + $0x30] sm:$0xff] }
0x14d6   :  { %2715 = vmatmul.mubr.msk.f32.vlgmr.msra.gmra.mrb[18].mxu1 %vm400_vm2, %v1418_v39  ;;  %2703 = vmatprep.mubr.msk.f32.mxu0 %vm400_vm2, %v1263_v40 }
0x14d7   :  { %2873 = vmatpush3.bf16.msra.mxu1 %v3516_v59  ;;  %2725 = vmatprep.mubr.msk.f32.mxu1 %vm3154_vm3, %v3155_v20 }
0x14d8   :  { %2874 = vmatprep.subr.bf16.mxu1 %v3153_v6 }
0x14db   :  { %2876 = vmatpush3.bf16.msra.mxu1 %v3526_v34 }
0x14dc   :  { %2883 = vmatprep.subr.bf16.mxu1 %v3153_v6 }
0x15a1   :  { %v1215_v42 = vpop.f32.mrb[16].mxu1 }
0x15a2   :  { %v1219_v7 = vadd.f32 %v1215_v42, %v386_v41  ;;  %v2685_v43 = vpop.f32.mrb[17].mxu1 }
0x15a4   :  { %v2415_v54 = vmul.f32 -1.442695, %v1219_v7 }
0x15a9   :  { %v1491_v18 = vpop.f32.mrb[18].mxu1 }
0x15aa   :  { %v1495_v46 = vadd.f32 %v1491_v18, %v1371_v45  ;;  %v2716_v47 = vpop.f32.mrb[19].mxu1 }
0x15ac   :  { %v2427_v58 = vmul.f32 -1.442695, %v1495_v46  ;;  %v1381_v46 = vadd.f32 %v3553_v44, %v3498_v15 }
0x15ae   :  { %2976 = vpow2.f32 %v2427_v58 }
0x15b8   :  { %v2977_v49 = vpop.eup %2976 }
0x15b9   :  { %v1499_v50 = vadd.f32 1.0, %v2977_v49 }
0x15bb   :  { %2978 = vrcp.f32 %v1499_v50 }
0x15bc   :  { %2980 = vpow2.f32 %v2415_v54 }
0x15c5   :  { %v2979_v51 = vpop.eup %2978 }
0x15c6   :  { %v1502_v48 = vmul.f32 2.0, %v2979_v51  ;;  %v2981_v55 = vpop.eup %2980  ;;  %v1508_v61 = vmul.f32 %v2979_v51, %v1506_v60 }
0x15c7   :  { %v1223_v57 = vadd.f32 1.0, %v2981_v55 }
0x15c8   :  { %v2428_v0 = vadd.f32 -1.0, %v1502_v48 }
0x15c9   :  { %2982 = vrcp.f32 %v1223_v57 }
0x15ca   :  { %1510 = vrot.lane.b32.xlu1 %v2428_v0, %s3156_s7 }
0x15d3   :  { %v2983_v2 = vpop.eup %2982 }
0x15d4   :  { %v1226_v3 = vmul.f32 2.0, %v2983_v2  ;;  %v1228_v13 = vmul.f32 %v2983_v2, %v3506_v28 }
0x15d6   :  { %v2416_v5 = vadd.f32 -1.0, %v1226_v3  ;;  %v1386_v3 = vadd.f32 %v3496_v14, %v3553_v44 }
0x163c   :  { %v1511_v52 = vpop.permute.xlu1 %1510 }
0x163d   :  { %v1513_v53 = vmul.f32 %v2979_v51, %v1511_v52 }
0x163f   :  { %1515 = vrot.lane.b32.xlu1 %v1513_v53, %s3157_s26 }
0x16b1   :  { %v1516_v62 = vpop.permute.xlu1 %1515 }
0x16b2   :  { %v1518_v63 = vadd.f32 %v1516_v62, %v1508_v61 }
0x16b4   :  { %2984 = vtanh.f32 %v1518_v63 }
0x16be   :  { %v2985_v4 = vpop.eup %2984 }
0x16bf   :  { %1521 = vrot.lane.b32.xlu0 %v2985_v4, %s3156_s7 }
0x16c3   :  { %1230 = vrot.lane.b32.xlu0 %v2416_v5, %s3156_s7 }
0x1731   :  { %v1522_v8 = vpop.permute.xlu0 %1521 }
0x1732   :  { %v1524_v9 = vmul.f32 %v2979_v51, %v1522_v8 }
0x1734   :  { %1527 = vrot.lane.b32.xlu1 %v1524_v9, %s3157_s26 }
0x1735   :  { %v1231_v10 = vpop.permute.xlu0 %1230 }
0x1736   :  { %v1233_v11 = vmul.f32 %v2983_v2, %v1231_v10 }
0x1738   :  { %1235 = vrot.lane.b32.xlu0 %v1233_v11, %s3157_s26 }
0x17a6   :  { %v1528_v56 = vpop.permute.xlu1 %1527 }
0x17a7   :  { %2726 = vmatmul.mubr.msk.f32.vlgmr.msra.gmra.mrb[20].mxu1 %vm400_vm2, %v1528_v56 }
0x17a8   :  { %2885 = vmatpush3.bf16.msra.mxu1 %v3516_v59  ;;  %2747 = vmatprep.mubr.msk.f32.mxu1 %vm3154_vm3, %v3155_v20 }
0x17a9   :  { %2886 = vmatprep.subr.bf16.mxu1 %v3153_v6 }
0x17aa   :  { %v1236_v16 = vpop.permute.xlu0 %1235 }
0x17ab   :  { %v3568_v17 = vadd.f32 %v1236_v16, %v1228_v13 }
0x17ac   :  { %2888 = vmatpush3.bf16.msra.mxu1 %v3526_v34 }
0x17ad   :  { %2986 = vtanh.f32 %v3568_v17  ;;  %2895 = vmatprep.subr.bf16.mxu1 %v3153_v6 }
0x17b7   :  { %v2987_v1 = vpop.eup %2986 }
0x17b8   :  { %1241 = vrot.lane.b32.xlu0 %v2987_v1, %s3156_s7 }
0x182a   :  { %v1242_v22 = vpop.permute.xlu0 %1241 }
0x182b   :  { %v1244_v23 = vmul.f32 %v2983_v2, %v1242_v22 }
0x182d   :  { %1246 = vrot.lane.b32.xlu0 %v1244_v23, %s3157_s26 }
0x187a   :  { %v1597_v25 = vpop.f32.mrb[20].mxu1 }
0x187b   :  { %v1601_v26 = vadd.f32 %v1597_v25, %v1376_v24  ;;  %v2727_v27 = vpop.f32.mrb[21].mxu1 }
0x187d   :  { %v2430_v28 = vmul.f32 -1.442695, %v1601_v26 }
0x187f   :  { %2988 = vpow2.f32 %v2430_v28 }
0x1889   :  { %v2989_v29 = vpop.eup %2988 }
0x188a   :  { %v1605_v30 = vadd.f32 1.0, %v2989_v29  ;;  %v1391_v29 = vadd.f32 %v3553_v44, %v3502_v21 }
0x188c   :  { %2990 = vrcp.f32 %v1605_v30 }
0x1896   :  { %v2991_v31 = vpop.eup %2990 }
0x1897   :  { %v1608_v32 = vmul.f32 2.0, %v2991_v31  ;;  %v1610_v40 = vmul.f32 %v2991_v31, %v1518_v63 }
0x1899   :  { %v2431_v33 = vadd.f32 -1.0, %v1608_v32 }
0x189b   :  { %1612 = vrot.lane.b32.xlu1 %v2431_v33, %s3156_s7 }
0x189f   :  { %v1247_v35 = vpop.permute.xlu0 %1246 }
0x18a0   :  { %1250 = vst.msk [vmem:[#allocation2 + $0x38] sm:$0xff] %vm400_vm2, %v1247_v35  ;;  %1251 = vst.msk [vmem:[#allocation10] sm:$0xff] %vm400_vm2, %v1247_v35 }
0x18a7   :  { %v1264_v36 = vld [vmem:[#allocation2 + $0x38] sm:$0xff] }
0x18a8   :  { %2704 = vmatmul.mubr.msk.f32.gmra.mrb[20].mxu0 %vm400_vm2, %v1264_v36 }
0x18a9   :  { %2736 = vmatprep.mubr.msk.f32.mxu0 %vm3154_vm3, %v3155_v20 }
0x190d   :  { %v1613_v12 = vpop.permute.xlu1 %1612 }
0x190e   :  { %v1615_v37 = vmul.f32 %v2991_v31, %v1613_v12 }
0x1910   :  { %1617 = vrot.lane.b32.xlu1 %v1615_v37, %s3157_s26 }
0x197b   :  { %v3584_v38 = vpop.f32.mrb[20].mxu0 }
0x197c   :  { %v3586_v39 = vpop.f32.mrb[21].mxu0 }
0x1982   :  { %v1618_v41 = vpop.permute.xlu1 %1617 }
0x1983   :  { %v1620_v42 = vadd.f32 %v1618_v41, %v1610_v40 }
0x1985   :  { %2992 = vtanh.f32 %v1620_v42 }
0x198f   :  { %v2993_v7 = vpop.eup %2992 }
0x1990   :  { %1623 = vrot.lane.b32.xlu1 %v2993_v7, %s3156_s7 }
0x1a02   :  { %v1624_v43 = vpop.permute.xlu1 %1623 }
0x1a03   :  { %v1626_v45 = vmul.f32 %v2991_v31, %v1624_v43 }
0x1a05   :  { %1629 = vrot.lane.b32.xlu1 %v1626_v45, %s3157_s26 }
0x1a77   :  { %v1630_v18 = vpop.permute.xlu1 %1629 }
0x1a78   :  { %2737 = vmatmul.mubr.msk.f32.vlgmr.msra.gmra.mrb[22].mxu0 %vm400_vm2, %v1630_v18 }
0x1a79   :  { %2891 = vmatpush3.bf16.msra.mxu0 %v3516_v59  ;;  %2758 = vmatprep.mubr.msk.f32.mxu0 %vm3154_vm3, %v3155_v20 }
0x1a7a   :  { %2892 = vmatprep.subr.bf16.mxu0 %v3153_v6 }
0x1a7d   :  { %2894 = vmatpush3.bf16.msra.mxu0 %v3526_v34 }
0x1a7e   :  { %2901 = vmatprep.subr.bf16.mxu0 %v3153_v6 }
0x1b4b   :  { %v1699_v47 = vpop.f32.mrb[22].mxu0 }
0x1b4c   :  { %v1703_v58 = vadd.f32 %v1699_v47, %v1381_v46  ;;  %v2738_v49 = vpop.f32.mrb[23].mxu0 }
0x1b4e   :  { %v2433_v50 = vmul.f32 -1.442695, %v1703_v58  ;;  %v1396_v58 = vadd.f32 %v3500_v19, %v3553_v44 }
0x1b50   :  { %2994 = vpow2.f32 %v2433_v50 }
0x1b5a   :  { %v2995_v51 = vpop.eup %2994 }
0x1b5b   :  { %v1707_v48 = vadd.f32 1.0, %v2995_v51 }
0x1b5d   :  { %2996 = vrcp.f32 %v1707_v48 }
0x1b67   :  { %v2997_v0 = vpop.eup %2996 }
0x1b68   :  { %v1710_v52 = vmul.f32 2.0, %v2997_v0  ;;  %v1712_v57 = vmul.f32 %v2997_v0, %v1620_v42 }
0x1b6a   :  { %v2434_v53 = vadd.f32 -1.0, %v1710_v52 }
0x1b6c   :  { %1714 = vrot.lane.b32.xlu0 %v2434_v53, %s3156_s7 }
0x1bde   :  { %v1715_v54 = vpop.permute.xlu0 %1714 }
0x1bdf   :  { %v1717_v55 = vmul.f32 %v2997_v0, %v1715_v54 }
0x1be1   :  { %1719 = vrot.lane.b32.xlu1 %v1717_v55, %s3157_s26 }
0x1c53   :  { %v1720_v60 = vpop.permute.xlu1 %1719 }
0x1c54   :  { %v1722_v15 = vadd.f32 %v1720_v60, %v1712_v57 }
0x1c56   :  { %2998 = vtanh.f32 %v1722_v15 }
0x1c60   :  { %v2999_v61 = vpop.eup %2998 }
0x1c61   :  { %1725 = vrot.lane.b32.xlu0 %v2999_v61, %s3156_s7 }
0x1cd3   :  { %v1726_v62 = vpop.permute.xlu0 %1725 }
0x1cd4   :  { %v1728_v63 = vmul.f32 %v2997_v0, %v1726_v62 }
0x1cd6   :  { %1731 = vrot.lane.b32.xlu1 %v1728_v63, %s3157_s26 }
0x1d48   :  { %v1732_v2 = vpop.permute.xlu1 %1731 }
0x1d49   :  { %2748 = vmatmul.mubr.msk.f32.vlgmr.msra.gmra.mrb[22].mxu1 %vm400_vm2, %v1732_v2  ;;  %v1401_v2 = vadd.f32 %v3553_v44, %v3586_v39 }
0x1d4a   :  { %2897 = vmatpush3.bf16.msra.mxu1 %v3516_v59  ;;  %2769 = vmatprep.mubr.msk.f32.mxu1 %vm3154_vm3, %v3155_v20 }
0x1d4b   :  { %2898 = vmatprep.subr.bf16.mxu1 %v3153_v6 }
0x1d4e   :  { %2900 = vmatpush3.bf16.msra.mxu1 %v3526_v34 }
0x1d4f   :  { %2907 = vmatprep.subr.bf16.mxu1 %v3153_v6 }
0x1e1c   :  { %v1801_v4 = vpop.f32.mrb[22].mxu1 }
0x1e1d   :  { %v1805_v5 = vadd.f32 %v1801_v4, %v1386_v3  ;;  %v2749_v8 = vpop.f32.mrb[23].mxu1 }
0x1e1f   :  { %v2436_v9 = vmul.f32 -1.442695, %v1805_v5 }
0x1e21   :  { %3000 = vpow2.f32 %v2436_v9 }
0x1e2b   :  { %v3001_v10 = vpop.eup %3000 }
0x1e2c   :  { %v1809_v11 = vadd.f32 1.0, %v3001_v10 }
0x1e2e   :  { %3002 = vrcp.f32 %v1809_v11 }
0x1e38   :  { %v3003_v56 = vpop.eup %3002 }
0x1e39   :  { %v1812_v13 = vmul.f32 2.0, %v3003_v56  ;;  %v1814_v23 = vmul.f32 %v3003_v56, %v1722_v15 }
0x1e3b   :  { %v2437_v16 = vadd.f32 -1.0, %v1812_v13 }
0x1e3d   :  { %1816 = vrot.lane.b32.xlu0 %v2437_v16, %s3156_s7 }
0x1eaf   :  { %v1817_v1 = vpop.permute.xlu0 %1816 }
0x1eb0   :  { %v1819_v22 = vmul.f32 %v3003_v56, %v1817_v1 }
0x1eb2   :  { %1821 = vrot.lane.b32.xlu1 %v1819_v22, %s3157_s26 }
0x1f24   :  { %v1822_v24 = vpop.permute.xlu1 %1821 }
0x1f25   :  { %v1824_v14 = vadd.f32 %v1822_v24, %v1814_v23 }
0x1f27   :  { %3004 = vtanh.f32 %v1824_v14 }
0x1f31   :  { %v3005_v25 = vpop.eup %3004 }
0x1f32   :  { %1827 = vrot.lane.b32.xlu0 %v3005_v25, %s3156_s7 }
0x1fa4   :  { %v1828_v26 = vpop.permute.xlu0 %1827 }
0x1fa5   :  { %v1830_v27 = vmul.f32 %v3003_v56, %v1828_v26  ;;  %v1406_v26 = vadd.f32 %v3584_v38, %v3553_v44  ;;  %v2251_v38 = vld [vmem:[%s3729_s11] sm:$0xff] }
0x1fa7   :  { %1833 = vrot.lane.b32.xlu1 %v1830_v27, %s3157_s26 }
0x2019   :  { %v1834_v28 = vpop.permute.xlu1 %1833 }
0x201a   :  { %2759 = vmatmul.mubr.msk.f32.vlgmr.msra.gmra.mrb[24].mxu0 %vm400_vm2, %v1834_v28 }
0x201b   :  { %2903 = vmatpush3.bf16.msra.mxu0 %v3516_v59  ;;  %2780 = vmatprep.mubr.msk.f32.mxu0 %vm3154_vm3, %v3155_v20 }
0x201c   :  { %2904 = vmatprep.subr.bf16.mxu0 %v3153_v6 }
0x201f   :  { %2906 = vmatpush3.bf16.msra.mxu0 %v3526_v34 }
0x2020   :  { %2913 = vmatprep.subr.bf16.mxu0 %v3153_v6 }
0x20ed   :  { %v1903_v30 = vpop.f32.mrb[24].mxu0 }
0x20ee   :  { %v1907_v31 = vadd.f32 %v1903_v30, %v1391_v29  ;;  %v2760_v32 = vpop.f32.mrb[25].mxu0 }
0x20f0   :  { %v2439_v33 = vmul.f32 -1.442695, %v1907_v31 }
0x20f2   :  { %3006 = vpow2.f32 %v2439_v33 }
0x20fc   :  { %v3007_v35 = vpop.eup %3006 }
0x20fd   :  { %v1911_v36 = vadd.f32 1.0, %v3007_v35 }
0x20ff   :  { %3008 = vrcp.f32 %v1911_v36 }
0x2109   :  { %v3009_v12 = vpop.eup %3008 }
0x210a   :  { %v1914_v37 = vmul.f32 2.0, %v3009_v12  ;;  %v1916_v7 = vmul.f32 %v3009_v12, %v1824_v14 }
0x210c   :  { %v2440_v40 = vadd.f32 -1.0, %v1914_v37 }
0x210e   :  { %1918 = vrot.lane.b32.xlu0 %v2440_v40, %s3156_s7 }
0x2180   :  { %v1919_v41 = vpop.permute.xlu0 %1918 }
0x2181   :  { %v1921_v42 = vmul.f32 %v3009_v12, %v1919_v41 }
0x2183   :  { %1923 = vrot.lane.b32.xlu1 %v1921_v42, %s3157_s26  ;;  %v2252_v42 = vld [vmem:[%s3729_s11 + $0x8] sm:$0xff] }
0x21f5   :  { %v1924_v43 = vpop.permute.xlu1 %1923 }
0x21f6   :  { %v1926_v21 = vadd.f32 %v1924_v43, %v1916_v7  ;;  %v2253_v7 = vld [vmem:[%s3729_s11 + $0x10] sm:$0xff]  ;;  %v2914_v43 = vpack.c.bf16 %v2252_v42, %v2251_v38 }
0x21f8   :  { %3010 = vtanh.f32 %v1926_v21 }
0x2202   :  { %v3011_v45 = vpop.eup %3010 }
0x2203   :  { %1929 = vrot.lane.b32.xlu0 %v3011_v45, %s3156_s7 }
0x2275   :  { %v1930_v18 = vpop.permute.xlu0 %1929 }
0x2276   :  { %v1932_v46 = vmul.f32 %v3009_v12, %v1930_v18 }
0x2278   :  { %1935 = vrot.lane.b32.xlu1 %v1932_v46, %s3157_s26 }
0x22ea   :  { %v1936_v47 = vpop.permute.xlu1 %1935 }
0x22eb   :  { %2770 = vmatmul.mubr.msk.f32.vlgmr.msra.gmra.mrb[24].mxu1 %vm400_vm2, %v1936_v47 }
0x22ec   :  { %2909 = vmatpush3.bf16.msra.mxu1 %v3516_v59  ;;  %2791 = vmatprep.mubr.msk.f32.mxu1 %vm3154_vm3, %v3155_v20 }
0x22ed   :  { %2910 = vmatprep.subr.bf16.mxu1 %v3153_v6 }
0x22f0   :  { %2912 = vmatpush3.bf16.msra.mxu1 %v3526_v34 }
0x23be   :  { %v2005_v49 = vpop.f32.mrb[24].mxu1 }
0x23bf   :  { %v2009_v50 = vadd.f32 %v2005_v49, %v1396_v58  ;;  %v2771_v51 = vpop.f32.mrb[25].mxu1 }
0x23c1   :  { %v2442_v48 = vmul.f32 -1.442695, %v2009_v50 }
0x23c3   :  { %3012 = vpow2.f32 %v2442_v48 }
0x23cd   :  { %v3013_v0 = vpop.eup %3012 }
0x23ce   :  { %v2013_v52 = vadd.f32 1.0, %v3013_v0 }
0x23d0   :  { %3014 = vrcp.f32 %v2013_v52 }
0x23da   :  { %v3015_v53 = vpop.eup %3014 }
0x23db   :  { %v2016_v59 = vmul.f32 2.0, %v3015_v53  ;;  %v2018_v34 = vmul.f32 %v3015_v53, %v1926_v21  ;;  %v2254_v21 = vld [vmem:[%s3729_s11 + $0x18] sm:$0xff]  ;;  %s3159_s11 = smov [#allocation10]  }
0x23dc   :  { %v2917_v45 = vpack.c.bf16 %v2254_v21, %v2253_v7 }
0x23dd   :  { %v2443_v54 = vadd.f32 -1.0, %v2016_v59 }
0x23df   :  { %2020 = vrot.lane.b32.xlu0 %v2443_v54, %s3156_s7 }
0x2451   :  { %v2021_v55 = vpop.permute.xlu0 %2020 }
0x2452   :  { %v2023_v57 = vmul.f32 %v3015_v53, %v2021_v55 }
0x2454   :  { %2025 = vrot.lane.b32.xlu1 %v2023_v57, %s3157_s26 }
0x24c6   :  { %v2026_v60 = vpop.permute.xlu1 %2025 }
0x24c7   :  { %v2028_v19 = vadd.f32 %v2026_v60, %v2018_v34 }
0x24c9   :  { %3016 = vtanh.f32 %v2028_v19 }
0x24d3   :  { %v3017_v15 = vpop.eup %3016 }
0x24d4   :  { %2031 = vrot.lane.b32.xlu0 %v3017_v15, %s3156_s7 }
0x2546   :  { %v2032_v61 = vpop.permute.xlu0 %2031 }
0x2547   :  { %v2034_v62 = vmul.f32 %v3015_v53, %v2032_v61 }
0x2549   :  { %2037 = vrot.lane.b32.xlu1 %v2034_v62, %s3157_s26 }
0x25bb   :  { %v2038_v63 = vpop.permute.xlu1 %2037 }
0x25bc   :  { %2781 = vmatmul.mubr.msk.f32.vlgmr.msra.gmra.mrb[26].mxu0 %vm400_vm2, %v2038_v63 }
0x25bd   :  { %2802 = vmatprep.mubr.msk.f32.mxu0 %vm3154_vm3, %v3155_v20  ;;  %2915 = vmatpush3.bf16.msra.mxu0 %v2914_v43 }
0x25be   :  { %2916 = vmatprep.subr.bf16.mxu0 %v3153_v6 }
0x25c1   :  { %2918 = vmatpush3.bf16.msra.mxu0 %v2917_v45 }
0x268f   :  { %v2107_v3 = vpop.f32.mrb[26].mxu0 }
0x2690   :  { %v2111_v4 = vadd.f32 %v2107_v3, %v1401_v2  ;;  %v2782_v5 = vpop.f32.mrb[27].mxu0 }
0x2692   :  { %v2445_v8 = vmul.f32 -1.442695, %v2111_v4 }
0x2694   :  { %3018 = vpow2.f32 %v2445_v8 }
0x269e   :  { %v3019_v9 = vpop.eup %3018 }
0x269f   :  { %v2115_v10 = vadd.f32 1.0, %v3019_v9 }
0x26a1   :  { %3020 = vrcp.f32 %v2115_v10 }
0x26ab   :  { %v3021_v11 = vpop.eup %3020 }
0x26ac   :  { %v2118_v56 = vmul.f32 2.0, %v3021_v11  ;;  %v2120_v20 = vmul.f32 %v3021_v11, %v2028_v19 }
0x26ae   :  { %v2446_v13 = vadd.f32 -1.0, %v2118_v56 }
0x26b0   :  { %2122 = vrot.lane.b32.xlu0 %v2446_v13, %s3156_s7 }
0x2722   :  { %v2123_v16 = vpop.permute.xlu0 %2122 }
0x2723   :  { %v2125_v1 = vmul.f32 %v3021_v11, %v2123_v16 }
0x2725   :  { %2127 = vrot.lane.b32.xlu1 %v2125_v1, %s3157_s26 }
0x2797   :  { %v2128_v22 = vpop.permute.xlu1 %2127 }
0x2798   :  { %v2130_v39 = vadd.f32 %v2128_v22, %v2120_v20 }
0x279a   :  { %3022 = vtanh.f32 %v2130_v39 }
0x27a4   :  { %v3023_v23 = vpop.eup %3022 }
0x27a5   :  { %2133 = vrot.lane.b32.xlu0 %v3023_v23, %s3156_s7 }
0x2817   :  { %v2134_v24 = vpop.permute.xlu0 %2133 }
0x2818   :  { %v2136_v14 = vmul.f32 %v3021_v11, %v2134_v24 }
0x281a   :  { %2139 = vrot.lane.b32.xlu1 %v2136_v14, %s3157_s26 }
0x288c   :  { %v2140_v25 = vpop.permute.xlu1 %2139 }
0x288d   :  { %2792 = vmatmul.mubr.msk.f32.vlgmr.msra.gmra.mrb[26].mxu1 %vm400_vm2, %v2140_v25 }
0x2960   :  { %v2209_v27 = vpop.f32.mrb[26].mxu1 }
0x2961   :  { %v2213_v28 = vadd.f32 %v2209_v27, %v1406_v26  ;;  %v2793_v29 = vpop.f32.mrb[27].mxu1 }
0x2963   :  { %v2448_v30 = vmul.f32 -1.442695, %v2213_v28 }
0x2965   :  { %3024 = vpow2.f32 %v2448_v30 }
0x296f   :  { %v3025_v31 = vpop.eup %3024 }
0x2970   :  { %v2217_v32 = vadd.f32 1.0, %v3025_v31 }
0x2972   :  { %3026 = vrcp.f32 %v2217_v32 }
0x297c   :  { %v3027_v33 = vpop.eup %3026 }
0x297d   :  { %v2220_v35 = vmul.f32 2.0, %v3027_v33  ;;  %v2222_v40 = vmul.f32 %v3027_v33, %v2130_v39 }
0x297f   :  { %v2449_v36 = vadd.f32 -1.0, %v2220_v35 }
0x2981   :  { %2224 = vrot.lane.b32.xlu0 %v2449_v36, %s3156_s7 }
0x29f3   :  { %v2225_v12 = vpop.permute.xlu0 %2224 }
0x29f4   :  { %v2227_v37 = vmul.f32 %v3027_v33, %v2225_v12 }
0x29f6   :  { %2229 = vrot.lane.b32.xlu1 %v2227_v37, %s3157_s26 }
0x2a68   :  { %v2230_v41 = vpop.permute.xlu1 %2229 }
0x2a69   :  { %v2232_v44 = vadd.f32 %v2230_v41, %v2222_v40 }
0x2a6b   :  { %3028 = vtanh.f32 %v2232_v44 }
0x2a75   :  { %v3029_v18 = vpop.eup %3028 }
0x2a76   :  { %2235 = vrot.lane.b32.xlu0 %v3029_v18, %s3156_s7  ;;  %s2343_s7 = sshll.u32 %s3159_s11, 4  ;;  %s2344_s7 = int_to_ptr.vmem [resolvable:$true] %s2343_s7 }
0x2a77   :  { %p3101_p11 = scmp.lt.s32.totalorder %s2344_s7, %s2344_s7 }
0x2a7a   :  { %1253 = vrot.lane.b32.xlu0 %v3568_v17, %s3158_s2 }
0x2ae8   :  { %v2236_v46 = vpop.permute.xlu0 %2235 }
0x2ae9   :  { %v2238_v47 = vmul.f32 %v3027_v33, %v2236_v46 }
0x2aeb   :  { %2240 = vrot.lane.b32.xlu1 %v2238_v47, %s3157_s26  ;;  %s3096_s26 = scalar_lea.vmem %s2344_s7, 256 }
0x2aec   :  { %v1254_v58 = vpop.permute.xlu0 %1253  ;;  %p3097_p10 = scmp.ne.s32.totalorder %s2344_s7, %s3096_s26  ;;  %p3102_p12 = scmp.lt.s32.totalorder %s3096_s26, %s3096_s26 }
0x2aed   :  { %1256 = vst.msk [vmem:[#allocation11] sm:$0xff] %vm400_vm2, %v1254_v58 }
0x2aee   :  { %p3103_p13 = por %p3102_p12, %p3101_p11 }
0x2aef   :  { %2246 = vrot.lane.b32.xlu1 %v2232_v44, %s3158_s2 }
0x2af0   :  { %p3104_p0 = pnand %p3103_p13, %p3097_p10 }
0x2b5d   :  { %v2241_v49 = vpop.permute.xlu1 %2240 }
0x2b5e   :  { %2244 = vst.msk [vmem:[#allocation10 + $0x8] sm:$0xff] %vm400_vm2, %v2241_v49  ;;  %2803 = vmatmul.mubr.msk.f32.vlgmr.msra.gmra.mrb[28].mxu0 %vm400_vm2, %v2241_v49 }
0x2b61   :  { %v2247_v6 = vpop.permute.xlu1 %2246 }
0x2b62   :  { %2250 = vst.msk [vmem:[#allocation11 + $0x8] sm:$0xff] %vm400_vm2, %v2247_v6 }
0x2b63   :  { %3107 = shalt.err (!%p3104_p0)
}
0x2b64   :  { %s3108_s17 = scalar_lea.hbm %s3732_s14, 256 }
0x2b65   :  { %p3109_p1 = scmp.ne.s32.totalorder %s3732_s14, %s3108_s17  ;;  %p3112_p2 = scmp.lt.u32.totalorder %s3108_s17, %s3732_s14 }
0x2b67   :  { %p3114_p3 = pnand %p3112_p2, %p3109_p1 }
0x2b69   :  { %3117 = shalt.err (!%p3114_p3)
}
0x2b6a   :  { %2349 = dma.vmem_to_hbm [thread:$0]  %s2344_s7, 256, %s3732_s14, [#allocation6], %s3150_s30, %s3150_s30, %s3151_s16  }
0x2b6b   :  { %s3118_s9 = scalar_lea.vmem %s3675_s29, 256  ;;  %p3123_p5 = scmp.lt.s32.totalorder %s3675_s29, %s3675_s29 }
0x2b6c   :  { %p3119_p4 = scmp.ne.s32.totalorder %s3675_s29, %s3118_s9  ;;  %p3124_p6 = scmp.lt.s32.totalorder %s3118_s9, %s3118_s9 }
0x2b6e   :  { %p3125_p7 = por %p3124_p6, %p3123_p5 }
0x2b70   :  { %p3126_p8 = pnand %p3125_p7, %p3119_p4 }
0x2b72   :  { %3129 = shalt.err (!%p3126_p8)
}
0x2b73   :  { %s3130_s5 = scalar_lea.hbm %s3733_s15, 256 }
0x2b74   :  { %p3131_p9 = scmp.ne.s32.totalorder %s3733_s15, %s3130_s5  ;;  %p3134_p10 = scmp.lt.u32.totalorder %s3130_s5, %s3733_s15 }
0x2b76   :  { %p3136_p11 = pnand %p3134_p10, %p3131_p9 }
0x2b78   :  { %3139 = shalt.err (!%p3136_p11)
}
0x2b79   :  { %2361 = dma.vmem_to_hbm [thread:$0]  %s3675_s29, 256, %s3733_s15, [#allocation12], %s3150_s30, %s3150_s30, %s3151_s16   ;;  %vm2334_vm5 = vcmask 15360  }
0x2b7a   :  { %v2450_v17 = vld [vmem:[%s3730_s12] ss:$0 sm:$0xff] }
0x2c31   :  { %v2330_v50 = vpop.f32.mrb[28].mxu0 }
0x2c32   :  { %v2331_v51 = vadd.f32 %v2450_v17, %v2330_v50  ;;  %v2804_v48 = vpop.f32.mrb[29].mxu0 }
0x2c34   :  { %2335 = vst.msk [vmem:[%s3731_s13] sm:$0xff] %vm2334_vm5, %v2331_v51 }
0x2c35   :  { %3144 = dma.done.wait [#allocation6], 256  }
0x2c36   :  { %3145 = vsyncadd [#allocation6], 4294967040 }
0x2c37   :  { %3146 = dma.done.wait [#allocation12], 256  }
0x2c38   :  { %3147 = vsyncadd [#allocation12], 4294967040 }
0x2c39   :  { %2370 = vsyncpa [#allocation5], 1 }
0x2c3a   :  { %2371 = vsyncpa [#allocation8], 1 }
0x2c3b   :  { %2372 = vsyncpa [#allocation6], 1 }
0x2c3c   :  { %2373 = vsyncpa [#allocation12], 1 }

</bundles_post_ra>
